<compile_context>
chip_gen: v5e
topology: v5e:2x2
jax: 0.10.0
libtpu: 0.0.40
codegen_flags: <defaults>
</compile_context>

<pallas_src>
import functools

import jax
import jax.numpy as jnp
from jax.experimental import pallas as pl
from jax.experimental.pallas import tpu as pltpu

CONV_OUT = 128     # BasicConv2d output channels (fixed by the module)
FC1_OUT = 1024     # fc1 output features (fixed by the module)
EPS = 1e-5         # BatchNorm2d default eps


# ----------------------------------------------------------------------------
# Kernel
# ----------------------------------------------------------------------------
def _aux_kernel(x_ref,                                  # (N, C, T) spatial tile
                wc_ref, bc_ref,                         # (C,128), (1,128)
                g_ref, b_ref,                           # BN scale/shift (1,128)
                w1_ref, b1_ref,                         # (128,1024), (1,1024)
                w2_ref, b2_ref,                         # (1024,NCp), (1,NCp)
                m1_ref, m2_ref,                         # dropout keep-masks
                o_ref,                                  # (N, NCp) f32
                pool_acc,                               # VMEM scratch (N, C) f32
                *, inv_hw, training):
    step = pl.program_id(0)

    @pl.when(step == 0)
    def _init():
        pool_acc[...] = jnp.zeros_like(pool_acc)

    # ---- global average pool: lane-axis sum of this spatial tile -----------
    pool_acc[...] += jnp.sum(x_ref[...], axis=2)        # (N, C)

    @pl.when(step == pl.num_programs(0) - 1)
    def _finalize():
        pooled = pool_acc[...] * inv_hw                  # (N, C) f32

        # 1x1 conv == one MXU matmul over channels (+ conv bias).
        y = jnp.dot(pooled, wc_ref[...],
                    preferred_element_type=jnp.float32) + bc_ref[...]

        if training:
            # BatchNorm2d, training mode: batch mean / biased variance
            # (spatial extent is 1x1 after the pool).
            mean = jnp.mean(y, axis=0, keepdims=True)
            var = jnp.mean((y - mean) ** 2, axis=0, keepdims=True)
            h = (y - mean) * jax.lax.rsqrt(var + EPS)
            h = h * g_ref[...] + b_ref[...]
        else:
            # Eval mode: running stats folded into scale/shift in the wrapper.
            h = y * g_ref[...] + b_ref[...]
        h = jnp.maximum(h, 0.0)                          # ReLU
        h = h * m1_ref[...]                              # dropout p=0.5 (inverted)

        # fc1 + ReLU
        z = jnp.dot(h, w1_ref[...],
                    preferred_element_type=jnp.float32) + b1_ref[...]
        z = jnp.maximum(z, 0.0)
        z = z * m2_ref[...]                              # dropout p=0.7 (inverted)

        # fc2 (logits, lane-padded)
        o_ref[...] = jnp.dot(z, w2_ref[...],
                             preferred_element_type=jnp.float32) + b2_ref[...]


# ----------------------------------------------------------------------------
# Tiling helpers
# ----------------------------------------------------------------------------
def _choose_tile(hw, n, c, budget_bytes):
    """Largest multiple-of-128 divisor of hw whose double-buffered (N,C,T) f32
    block fits the VMEM byte budget."""
    bytes_per_col = 2 * n * c * 4                      # 2 buffers, f32
    t_max = max(budget_bytes // bytes_per_col, 1)
    best = 0
    t = 128
    while t <= min(hw, t_max):
        if hw % t == 0:
            best = t
        t += 128
    if best:
        return best
    # No multiple-of-128 divisor fits: fall back to a single full-extent block.
    # TODO(synk): pad/mask HW to a multiple of 128 for awkward spatial sizes so
    # the tile always stays within the per-generation VMEM budget.
    return hw


def _vmem_limit_bytes(n, c, t, nc_pad):
    x_buf = 2 * n * c * t * 4
    w_buf = 2 * 4 * (c * CONV_OUT + 3 * CONV_OUT
                     + CONV_OUT * FC1_OUT + FC1_OUT
                     + FC1_OUT * nc_pad + nc_pad
                     + n * CONV_OUT + n * FC1_OUT)
    out_buf = 2 * n * nc_pad * 4
    scratch = n * c * 4
    slack = 8 * 1024 * 1024
    return int(min(128 * 1024 * 1024, x_buf + w_buf + out_buf + scratch + slack))


# ----------------------------------------------------------------------------
# Parameter prep (done ONCE, outside the per-call path)
# ----------------------------------------------------------------------------
def prepare_params(params):
    """Transpose / pad weights into kernel layout once."""
    num_classes = params["fc2_w"].shape[0]
    in_ch = params["conv_w"].shape[1]
    nc_pad = ((num_classes + 127) // 128) * 128
    w2 = jnp.transpose(params["fc2_w"]).astype(jnp.float32)          # (1024, NC)
    w2 = jnp.pad(w2, ((0, 0), (0, nc_pad - num_classes)))
    b2 = jnp.pad(params["fc2_b"], (0, nc_pad - num_classes)).reshape(1, nc_pad)
    return {
        "wc": jnp.transpose(params["conv_w"].reshape(CONV_OUT, in_ch)),  # (C,128)
        "bc": params["conv_b"].reshape(1, CONV_OUT),
        "gamma": params["gamma"],
        "beta": params["beta"],
        "running_mean": params["running_mean"],
        "running_var": params["running_var"],
        "w1": jnp.transpose(params["fc1_w"]),                            # (128,1024)
        "b1": params["fc1_b"].reshape(1, FC1_OUT),
        "w2": w2,
        "b2": b2,
    }


# ----------------------------------------------------------------------------
# Forward wrapper
# ----------------------------------------------------------------------------
@functools.partial(jax.jit,
                   static_argnames=("num_classes", "training", "vmem_budget_bytes"))
def inception_aux_forward(x_nchw, prep, key, *, num_classes, training=True,
                          vmem_budget_bytes=8 * 1024 * 1024):
    """InceptionAux forward.  x_nchw: (N, C, H, W) f32 -> (N, num_classes) f32.

    `key` drives the dropout masks when training=True; pass a fresh key per
    call (reusing a key repeats the dropout masks)."""
    N, C, H, W = x_nchw.shape
    HW = H * W
    nc_pad = prep["w2"].shape[1]
    T = _choose_tile(HW, N, C, vmem_budget_bytes)

    # Native layout: (N, C, H*W) -- a free reshape, HW goes to the lane dim.
    x = x_nchw.reshape(N, C, HW)

    # BatchNorm scale/shift (eval mode folds running stats).
    if training:
        g = prep["gamma"].reshape(1, CONV_OUT)
        b = prep["beta"].reshape(1, CONV_OUT)
    else:
        scale = prep["gamma"] * jax.lax.rsqrt(prep["running_var"] + EPS)
        g = scale.reshape(1, CONV_OUT)
        b = (prep["beta"] - prep["running_mean"] * scale).reshape(1, CONV_OUT)

    # Dropout keep-masks (inverted dropout), generated host-side with
    # jax.random: pltpu.prng_* has no interpret lowering and the masks are tiny.
    if training:
        k1, k2 = jax.random.split(key)
        m1 = jax.random.bernoulli(k1, 0.5, (N, CONV_OUT)).astype(jnp.float32) * 2.0
        m2 = jax.random.bernoulli(k2, 0.3, (N, FC1_OUT)).astype(jnp.float32) * (1.0 / 0.3)
    else:
        m1 = jnp.ones((N, CONV_OUT), jnp.float32)
        m2 = jnp.ones((N, FC1_OUT), jnp.float32)

    kern = functools.partial(_aux_kernel, inv_hw=1.0 / HW, training=training)

    out_pad = pl.pallas_call(
        kern,
        out_shape=jax.ShapeDtypeStruct((N, nc_pad), jnp.float32),
        grid_spec=pltpu.PrefetchScalarGridSpec(
            num_scalar_prefetch=0,
            grid=(HW // T,),                       # stream spatial tiles
            in_specs=[
                pl.BlockSpec((N, C, T), lambda i: (0, 0, i)),
                pl.BlockSpec((C, CONV_OUT), lambda i: (0, 0)),
                pl.BlockSpec((1, CONV_OUT), lambda i: (0, 0)),
                pl.BlockSpec((1, CONV_OUT), lambda i: (0, 0)),
                pl.BlockSpec((1, CONV_OUT), lambda i: (0, 0)),
                pl.BlockSpec((CONV_OUT, FC1_OUT), lambda i: (0, 0)),
                pl.BlockSpec((1, FC1_OUT), lambda i: (0, 0)),
                pl.BlockSpec((FC1_OUT, nc_pad), lambda i: (0, 0)),
                pl.BlockSpec((1, nc_pad), lambda i: (0, 0)),
                pl.BlockSpec((N, CONV_OUT), lambda i: (0, 0)),
                pl.BlockSpec((N, FC1_OUT), lambda i: (0, 0)),
            ],
            out_specs=pl.BlockSpec((N, nc_pad), lambda i: (0, 0)),
            scratch_shapes=[pltpu.VMEM((N, C), jnp.float32)],
        ),
        compiler_params=pltpu.CompilerParams(
            dimension_semantics=("arbitrary",),    # spatial axis is a reduction
            vmem_limit_bytes=_vmem_limit_bytes(N, C, T, nc_pad)),
    )(x, prep["wc"], prep["bc"], g, b, prep["w1"], prep["b1"],
      prep["w2"], prep["b2"], m1, m2)

    return out_pad[:, :num_classes]


# ----------------------------------------------------------------------------
# Parameters (deterministic, synthetic) & pure-JAX reference (dropout off)
# ----------------------------------------------------------------------------
def make_params(key, in_ch, num_classes):
    ks = jax.random.split(key, 10)
    return {
        "conv_w": 0.1 * jax.random.normal(ks[0], (CONV_OUT, in_ch, 1, 1), jnp.float32),
        "conv_b": 0.05 * jax.random.normal(ks[1], (CONV_OUT,), jnp.float32),
        "gamma": 1.0 + 0.1 * jax.random.normal(ks[2], (CONV_OUT,), jnp.float32),
        "beta": 0.1 * jax.random.normal(ks[3], (CONV_OUT,), jnp.float32),
        "running_mean": 0.05 * jax.random.normal(ks[4], (CONV_OUT,), jnp.float32),
        "running_var": 0.5 + jax.random.uniform(ks[5], (CONV_OUT,), jnp.float32),
        # fc1: Linear(128 -> 1024)  (see TODO(synk) header note re: 2048)
        "fc1_w": 0.05 * jax.random.normal(ks[6], (FC1_OUT, CONV_OUT), jnp.float32),
        "fc1_b": 0.05 * jax.random.normal(ks[7], (FC1_OUT,), jnp.float32),
        "fc2_w": 0.05 * jax.random.normal(ks[8], (num_classes, FC1_OUT), jnp.float32),
        "fc2_b": 0.05 * jax.random.normal(ks[9], (num_classes,), jnp.float32),
    }


def reference_forward(x_nchw, params, training):
    """Pure-JAX f32 reference (dropout disabled), for the numerics self-check."""
    N, C, H, W = x_nchw.shape
    pooled = jnp.mean(x_nchw, axis=(2, 3))                        # (N, C)
    y = pooled @ params["conv_w"].reshape(CONV_OUT, C).T + params["conv_b"][None, :]
    if training:
        mean = jnp.mean(y, axis=0, keepdims=True)
        var = jnp.mean((y - mean) ** 2, axis=0, keepdims=True)
    else:
        mean = params["running_mean"][None, :]
        var = params["running_var"][None, :]
    h = (y - mean) * jax.lax.rsqrt(var + EPS)
    h = h * params["gamma"][None, :] + params["beta"][None, :]
    h = jnp.maximum(h, 0.0)
    z = jnp.maximum(h @ params["fc1_w"].T + params["fc1_b"][None, :], 0.0)
    return z @ params["fc2_w"].T + params["fc2_b"][None, :]


# ----------------------------------------------------------------------------
if __name__ == "__main__":
    key = jax.random.PRNGKey(0)
    kx, kp, kd = jax.random.split(key, 3)

    # Small example: InceptionAux(in_channel=64, num_classes=16) on 16x16 maps.
    N, C, H, W = 4, 64, 16, 16
    NUM_CLASSES = 16
    x = jax.random.normal(kx, (N, C, H, W), jnp.float32)
    params = make_params(kp, C, NUM_CLASSES)
    prep = prepare_params(params)

    # 1) Eval-mode numerics check vs. pure-JAX reference (running-stat BN,
    #    dropout off).  The tiny VMEM budget forces T=128 -> 2 spatial grid
    #    steps, exercising the streaming pool accumulator.
    out_eval = inception_aux_forward(x, prep, kd, num_classes=NUM_CLASSES,
                                     training=False, vmem_budget_bytes=256 * 1024)
    out_eval = jax.block_until_ready(out_eval)
    ref_eval = reference_forward(x, params, training=False)
    assert out_eval.shape == (N, NUM_CLASSES), out_eval.shape
    assert bool(jnp.allclose(out_eval, ref_eval, rtol=2e-2, atol=2e-2)), (
        "max abs err = %f" % float(jnp.max(jnp.abs(out_eval - ref_eval))))

    # 2) Training-mode forward (module default): batch-stat BN + active dropout,
    #    default (budget-driven) tile size.
    out_train = inception_aux_forward(x, prep, kd, num_classes=NUM_CLASSES,
                                      training=True)
    out_train = jax.block_until_ready(out_train)
    assert out_train.shape == (N, NUM_CLASSES), out_train.shape
    assert bool(jnp.all(jnp.isfinite(out_train)))

    print("KERNEL_OK")
</pallas_src>

<mosaic_0001>
module attributes {stable_mosaic.version = 11 : i64} {
  func.func @_aux_kernel(%arg0: i32, %arg1: memref<4x64x128xf32, #tpu.memory_space<vmem>>, %arg2: memref<64x128xf32, #tpu.memory_space<vmem>>, %arg3: memref<1x128xf32, #tpu.memory_space<vmem>>, %arg4: memref<1x128xf32, #tpu.memory_space<vmem>>, %arg5: memref<1x128xf32, #tpu.memory_space<vmem>>, %arg6: memref<128x1024xf32, #tpu.memory_space<vmem>>, %arg7: memref<1x1024xf32, #tpu.memory_space<vmem>>, %arg8: memref<1024x128xf32, #tpu.memory_space<vmem>>, %arg9: memref<1x128xf32, #tpu.memory_space<vmem>>, %arg10: memref<4x128xf32, #tpu.memory_space<vmem>>, %arg11: memref<4x1024xf32, #tpu.memory_space<vmem>>, %arg12: memref<4x128xf32, #tpu.memory_space<vmem>>, %arg13: memref<4x64xf32, #tpu.memory_space<vmem>>) attributes {dimension_semantics = [#tpu.dimension_semantics<arbitrary>], iteration_bounds = array<i64: 2>, scalar_prefetch = 0 : i64, scratch_operands = 1 : i64, tpu.core_type = #tpu.core_type<tc>, window_params = [{transform_indices = @transform_0, window_bounds = array<i64: 4, 64, 128>}, {pipeline_mode = #tpu.pipeline_mode<synchronous>, transform_indices = @transform_1, window_bounds = array<i64: 64, 128>}, {pipeline_mode = #tpu.pipeline_mode<synchronous>, transform_indices = @transform_2, window_bounds = array<i64: 1, 128>}, {pipeline_mode = #tpu.pipeline_mode<synchronous>, transform_indices = @transform_3, window_bounds = array<i64: 1, 128>}, {pipeline_mode = #tpu.pipeline_mode<synchronous>, transform_indices = @transform_4, window_bounds = array<i64: 1, 128>}, {pipeline_mode = #tpu.pipeline_mode<synchronous>, transform_indices = @transform_5, window_bounds = array<i64: 128, 1024>}, {pipeline_mode = #tpu.pipeline_mode<synchronous>, transform_indices = @transform_6, window_bounds = array<i64: 1, 1024>}, {pipeline_mode = #tpu.pipeline_mode<synchronous>, transform_indices = @transform_7, window_bounds = array<i64: 1024, 128>}, {pipeline_mode = #tpu.pipeline_mode<synchronous>, transform_indices = @transform_8, window_bounds = array<i64: 1, 128>}, {pipeline_mode = #tpu.pipeline_mode<synchronous>, transform_indices = @transform_9, window_bounds = array<i64: 4, 128>}, {pipeline_mode = #tpu.pipeline_mode<synchronous>, transform_indices = @transform_10, window_bounds = array<i64: 4, 1024>}, {pipeline_mode = #tpu.pipeline_mode<synchronous>, transform_indices = @transform_11, window_bounds = array<i64: 4, 128>}]} {
    %c0_i32 = arith.constant 0 : i32
    %0 = arith.cmpi eq, %arg0, %c0_i32 : i32
    %1 = arith.extui %0 : i1 to i32
    %c0_i32_0 = arith.constant 0 : i32
    %2 = arith.cmpi ne, %1, %c0_i32_0 : i32
    scf.if %2 {
      %cst_8 = arith.constant 0.000000e+00 : f32
      %11 = vector.broadcast %cst_8 : f32 to vector<4x64xf32>
      %c0_9 = arith.constant 0 : index
      %c0_10 = arith.constant 0 : index
      %12 = vector.load %arg13[%c0_9, %c0_10] : memref<4x64xf32, #tpu.memory_space<vmem>>, vector<4x64xf32>
      tpu.vector_store %arg13[%c0_9, %c0_10], %11 {strides = array<i32>} : memref<4x64xf32, #tpu.memory_space<vmem>>, vector<4x64xf32>,
    } else {
    }
    %c0 = arith.constant 0 : index
    %c0_1 = arith.constant 0 : index
    %3 = vector.load %arg13[%c0, %c0_1] : memref<4x64xf32, #tpu.memory_space<vmem>>, vector<4x64xf32>
    %c0_2 = arith.constant 0 : index
    %c0_3 = arith.constant 0 : index
    %c0_4 = arith.constant 0 : index
    %4 = vector.load %arg1[%c0_2, %c0_3, %c0_4] : memref<4x64x128xf32, #tpu.memory_space<vmem>>, vector<4x64x128xf32>
    %cst = arith.constant dense<0.000000e+00> : vector<4x64xf32>
    %5 = vector.multi_reduction <add>, %4, %cst [2] : vector<4x64x128xf32> to vector<4x64xf32>
    %6 = arith.addf %3, %5 : vector<4x64xf32>
    %c0_5 = arith.constant 0 : index
    %c0_6 = arith.constant 0 : index
    %7 = vector.load %arg13[%c0_5, %c0_6] : memref<4x64xf32, #tpu.memory_space<vmem>>, vector<4x64xf32>
    tpu.vector_store %arg13[%c0_5, %c0_6], %6 {strides = array<i32>} : memref<4x64xf32, #tpu.memory_space<vmem>>, vector<4x64xf32>,
    %c1_i32 = arith.constant 1 : i32
    %8 = arith.cmpi eq, %arg0, %c1_i32 : i32
    %9 = arith.extui %8 : i1 to i32
    %c0_i32_7 = arith.constant 0 : i32
    %10 = arith.cmpi ne, %9, %c0_i32_7 : i32
    scf.if %10 {
      %c0_8 = arith.constant 0 : index
      %c0_9 = arith.constant 0 : index
      %11 = vector.load %arg13[%c0_8, %c0_9] : memref<4x64xf32, #tpu.memory_space<vmem>>, vector<4x64xf32>
      %cst_10 = arith.constant 3.906250e-03 : f32
      %12 = vector.broadcast %cst_10 : f32 to vector<4x64xf32>
      %13 = arith.mulf %11, %12 : vector<4x64xf32>
      %c0_11 = arith.constant 0 : index
      %c0_12 = arith.constant 0 : index
      %14 = vector.load %arg2[%c0_11, %c0_12] : memref<64x128xf32, #tpu.memory_space<vmem>>, vector<64x128xf32>
      %cst_13 = arith.constant dense<0.000000e+00> : vector<4x128xf32>
      %15 = tpu.matmul %13, %14, %cst_13 {dimension_numbers = #tpu.dot_dimension_numbers<[1], [0], [0], [1], [0, 0, 1, 1], [], []>} : vector<4x64xf32>, vector<64x128xf32>, vector<4x128xf32> -> vector<4x128xf32>
      %c0_14 = arith.constant 0 : index
      %c0_15 = arith.constant 0 : index
      %16 = vector.load %arg3[%c0_14, %c0_15] : memref<1x128xf32, #tpu.memory_space<vmem>>, vector<1x128xf32>
      %17 = vector.broadcast %16 : vector<1x128xf32> to vector<4x128xf32>
      %18 = arith.addf %15, %17 : vector<4x128xf32>
      %c0_16 = arith.constant 0 : index
      %c0_17 = arith.constant 0 : index
      %19 = vector.load %arg4[%c0_16, %c0_17] : memref<1x128xf32, #tpu.memory_space<vmem>>, vector<1x128xf32>
      %20 = vector.broadcast %19 : vector<1x128xf32> to vector<4x128xf32>
      %21 = arith.mulf %18, %20 : vector<4x128xf32>
      %c0_18 = arith.constant 0 : index
      %c0_19 = arith.constant 0 : index
      %22 = vector.load %arg5[%c0_18, %c0_19] : memref<1x128xf32, #tpu.memory_space<vmem>>, vector<1x128xf32>
      %23 = vector.broadcast %22 : vector<1x128xf32> to vector<4x128xf32>
      %24 = arith.addf %21, %23 : vector<4x128xf32>
      %cst_20 = arith.constant 0.000000e+00 : f32
      %25 = vector.broadcast %cst_20 : f32 to vector<4x128xf32>
      %26 = arith.maximumf %24, %25 : vector<4x128xf32>
      %c0_21 = arith.constant 0 : index
      %c0_22 = arith.constant 0 : index
      %27 = vector.load %arg10[%c0_21, %c0_22] : memref<4x128xf32, #tpu.memory_space<vmem>>, vector<4x128xf32>
      %28 = arith.mulf %26, %27 : vector<4x128xf32>
      %c0_23 = arith.constant 0 : index
      %c0_24 = arith.constant 0 : index
      %29 = vector.load %arg6[%c0_23, %c0_24] : memref<128x1024xf32, #tpu.memory_space<vmem>>, vector<128x1024xf32>
      %cst_25 = arith.constant dense<0.000000e+00> : vector<4x1024xf32>
      %30 = tpu.matmul %28, %29, %cst_25 {dimension_numbers = #tpu.dot_dimension_numbers<[1], [0], [0], [1], [0, 0, 1, 1], [], []>} : vector<4x128xf32>, vector<128x1024xf32>, vector<4x1024xf32> -> vector<4x1024xf32>
      %c0_26 = arith.constant 0 : index
      %c0_27 = arith.constant 0 : index
      %31 = vector.load %arg7[%c0_26, %c0_27] : memref<1x1024xf32, #tpu.memory_space<vmem>>, vector<1x1024xf32>
      %32 = vector.broadcast %31 : vector<1x1024xf32> to vector<4x1024xf32>
      %33 = arith.addf %30, %32 : vector<4x1024xf32>
      %cst_28 = arith.constant 0.000000e+00 : f32
      %34 = vector.broadcast %cst_28 : f32 to vector<4x1024xf32>
      %35 = arith.maximumf %33, %34 : vector<4x1024xf32>
      %c0_29 = arith.constant 0 : index
      %c0_30 = arith.constant 0 : index
      %36 = vector.load %arg11[%c0_29, %c0_30] : memref<4x1024xf32, #tpu.memory_space<vmem>>, vector<4x1024xf32>
      %37 = arith.mulf %35, %36 : vector<4x1024xf32>
      %c0_31 = arith.constant 0 : index
      %c0_32 = arith.constant 0 : index
      %38 = vector.load %arg8[%c0_31, %c0_32] : memref<1024x128xf32, #tpu.memory_space<vmem>>, vector<1024x128xf32>
      %cst_33 = arith.constant dense<0.000000e+00> : vector<4x128xf32>
      %39 = tpu.matmul %37, %38, %cst_33 {dimension_numbers = #tpu.dot_dimension_numbers<[1], [0], [0], [1], [0, 0, 1, 1], [], []>} : vector<4x1024xf32>, vector<1024x128xf32>, vector<4x128xf32> -> vector<4x128xf32>
      %c0_34 = arith.constant 0 : index
      %c0_35 = arith.constant 0 : index
      %40 = vector.load %arg9[%c0_34, %c0_35] : memref<1x128xf32, #tpu.memory_space<vmem>>, vector<1x128xf32>
      %41 = vector.broadcast %40 : vector<1x128xf32> to vector<4x128xf32>
      %42 = arith.addf %39, %41 : vector<4x128xf32>
      %c0_36 = arith.constant 0 : index
      %c0_37 = arith.constant 0 : index
      %43 = vector.load %arg12[%c0_36, %c0_37] : memref<4x128xf32, #tpu.memory_space<vmem>>, vector<4x128xf32>
      tpu.vector_store %arg12[%c0_36, %c0_37], %42 {strides = array<i32>} : memref<4x128xf32, #tpu.memory_space<vmem>>, vector<4x128xf32>,
    } else {
    }
    return
  }
  func.func @transform_0(%arg0: i32) -> (i32, i32, i32) {
    %c0_i32 = arith.constant 0 : i32
    %c0_i32_0 = arith.constant 0 : i32
    %c0_i32_1 = arith.constant 0 : i32
    return %c0_i32, %c0_i32_0, %arg0 : i32, i32, i32
  }
  func.func @transform_1(%arg0: i32) -> (i32, i32) {
    %c0_i32 = arith.constant 0 : i32
    %c0_i32_0 = arith.constant 0 : i32
    %c0_i32_1 = arith.constant 0 : i32
    return %c0_i32, %c0_i32_0 : i32, i32
  }
  func.func @transform_2(%arg0: i32) -> (i32, i32) {
    %c0_i32 = arith.constant 0 : i32
    %c0_i32_0 = arith.constant 0 : i32
    %c0_i32_1 = arith.constant 0 : i32
    return %c0_i32, %c0_i32_0 : i32, i32
  }
  func.func @transform_3(%arg0: i32) -> (i32, i32) {
    %c0_i32 = arith.constant 0 : i32
    %c0_i32_0 = arith.constant 0 : i32
    %c0_i32_1 = arith.constant 0 : i32
    return %c0_i32, %c0_i32_0 : i32, i32
  }
  func.func @transform_4(%arg0: i32) -> (i32, i32) {
    %c0_i32 = arith.constant 0 : i32
    %c0_i32_0 = arith.constant 0 : i32
    %c0_i32_1 = arith.constant 0 : i32
    return %c0_i32, %c0_i32_0 : i32, i32
  }
  func.func @transform_5(%arg0: i32) -> (i32, i32) {
    %c0_i32 = arith.constant 0 : i32
    %c0_i32_0 = arith.constant 0 : i32
    %c0_i32_1 = arith.constant 0 : i32
    return %c0_i32, %c0_i32_0 : i32, i32
  }
  func.func @transform_6(%arg0: i32) -> (i32, i32) {
    %c0_i32 = arith.constant 0 : i32
    %c0_i32_0 = arith.constant 0 : i32
    %c0_i32_1 = arith.constant 0 : i32
    return %c0_i32, %c0_i32_0 : i32, i32
  }
  func.func @transform_7(%arg0: i32) -> (i32, i32) {
    %c0_i32 = arith.constant 0 : i32
    %c0_i32_0 = arith.constant 0 : i32
    %c0_i32_1 = arith.constant 0 : i32
    return %c0_i32, %c0_i32_0 : i32, i32
  }
  func.func @transform_8(%arg0: i32) -> (i32, i32) {
    %c0_i32 = arith.constant 0 : i32
    %c0_i32_0 = arith.constant 0 : i32
    %c0_i32_1 = arith.constant 0 : i32
    return %c0_i32, %c0_i32_0 : i32, i32
  }
  func.func @transform_9(%arg0: i32) -> (i32, i32) {
    %c0_i32 = arith.constant 0 : i32
    %c0_i32_0 = arith.constant 0 : i32
    %c0_i32_1 = arith.constant 0 : i32
    return %c0_i32, %c0_i32_0 : i32, i32
  }
  func.func @transform_10(%arg0: i32) -> (i32, i32) {
    %c0_i32 = arith.constant 0 : i32
    %c0_i32_0 = arith.constant 0 : i32
    %c0_i32_1 = arith.constant 0 : i32
    return %c0_i32, %c0_i32_0 : i32, i32
  }
  func.func @transform_11(%arg0: i32) -> (i32, i32) {
    %c0_i32 = arith.constant 0 : i32
    %c0_i32_0 = arith.constant 0 : i32
    %c0_i32_1 = arith.constant 0 : i32
    return %c0_i32, %c0_i32_0 : i32, i32
  }
}

</mosaic_0001>

<bundles_post_ra>
// kernel: inception_aux_forward.1
= control target key start
LH: loop header
LB: loop body
LE: loop exit
PB: predicated region body
PF: predicated region fallthrough
CT: control target
= control target key end

     0   :  { %16 = vsyncpa [#allocation5], 0  ;;  %s2458_s0 = inlined_call_operand.vmem [shape: f32[4,64,256], index: 0, kind: input, shape index: {}]   ;;  %s2459_s1 = inlined_call_operand.vmem [shape: f32[64,128], index: 1, kind: input, shape index: {}]   ;;  %s2460_s2 = inlined_call_operand.vmem [shape: f32[1,128], index: 2, kind: input, shape index: {}]   ;;  %s2461_s3 = inlined_call_operand.vmem [shape: f32[1,128], index: 3, kind: input, shape index: {}]   ;;  %s2462_s4 = inlined_call_operand.vmem [shape: f32[1,128], index: 4, kind: input, shape index: {}]   ;;  %s2463_s5 = inlined_call_operand.vmem [shape: f32[128,1024], index: 5, kind: input, shape index: {}]   ;;  %s2464_s6 = inlined_call_operand.vmem [shape: f32[1,1024], index: 6, kind: input, shape index: {}]   ;;  %s2465_s7 = inlined_call_operand.hbm [shape: f32[1024,128], index: 7, kind: input, shape index: {}]   ;;  %s2466_s8 = inlined_call_operand.vmem [shape: f32[1,128], index: 8, kind: input, shape index: {}]   ;;  %s2467_s9 = inlined_call_operand.vmem [shape: f32[4,128], index: 9, kind: input, shape index: {}]   ;;  %s2468_s10 = inlined_call_operand.vmem [shape: f32[4,1024], index: 10, kind: input, shape index: {}]   ;;  %s2469_s11 = inlined_call_operand.hbm [shape: f32[4,128], index: 11, kind: output, shape index: {}]  }
   0x1   :  { %17 = vsyncpa [#allocation6], 0  ;;  %s1757_s17 = smov 0   ;;  %s1759_s18 = smov 0  }
   0x2   :  { %s1761_s19 = smov 0  }
   0x3 LB: > { %s1773_s20 = sadd.s32 4294967295, %s1690_s19   ;;  %s1776_s21 = sadd.s32 1, %s1690_s19   ;;  %s1690_s19 = sphi %s1761_s19, %s2474_s19   ;;  %s1686_s18 = sphi %s1759_s18, %s2473_s18   ;;  %s1682_s17 = sphi %s1757_s17, %s2472_s17  }
   0x4   : > { %s27_s22 = ssub.s32 %s1690_s19, %s1776_s21  ;;  %s30_s23 = sadd.s32 1, %s1686_s18 }
   0x5   : > { %p28_p0 = scmp.eq.s32.totalorder %s27_s22, 0  ;;  %p37_p1 = scmp.ne.s32.totalorder %s1686_s18, %s1682_s17 }
   0x6   : > { %p38_p2 = scmp.eq.s32.totalorder %s1690_s19, 0  ;;  %p1538_p3 = scmp.ge.s32.totalorder %s1690_s19, 1 }
   0x7   : > { %s1786_s24 = scalar_select %p28_p0, %s1686_s18, %s30_s23  }
   0x8   : > { %p1788_p4 = por %p38_p2, %p37_p1  ;;  %p285_p5 = scmp.lt.s32.totalorder %s1690_s19, 3 }
   0x9   : > { %p1539_p6 = scmp.ne.s32.totalorder %s1773_s20, 0  ;;  %p1565_p7 = scmp.eq.s32.totalorder %s1773_s20, 0 }
   0xa   : > { %p1795_p8 = pnand %p1538_p3, %p285_p5  ;;  %s314_s29 = sshll.u32 %s2465_s7, 4  ;;  %s315_s29 = int_to_ptr.hbm [resolvable:$true] %s314_s29 }
   0xb   : > { %s1692_s30 = smov [#allocation4]   ;;  %s1693_s13 = smov 128  }
   0xc   : > { %p1561_p9 = pneg %p1795_p8  ;;  %s316_s12 = sshll.u32 %s1692_s30, 4  ;;  %s317_s12 = int_to_ptr.vmem [resolvable:$true] %s316_s12 }
   0xd   : > { %s1694_s14 = smov 8   ;;  %p1540_p11 = scmp.ge.s32.totalorder %s1690_s19, 2 }
   0xe   : > { %p1562_p10 = pnand %p1565_p7, %p1561_p9 }
   0xf   : > { %335 = sbr.rel (%p1540_p11) target bundleno = 56 (0x38), region = 56 }
  0x10   : > { %1564 = dma.hbm_to_vmem [thread:$0]  (!%p1562_p10), %s315_s29, 16384, %s317_s12, [#allocation5], %s1693_s13, %s1693_s13, %s1694_s14  }
  0x14   : > { %338 = sbr.rel (!%p1788_p4) target bundleno = 56 (0x38), region = 60  ;;  %s340_s15 = sand.u32 (%p1788_p4), 1, %s1686_s18  }
  0x15   : > { %s1542_s16 = sshll.u32 (%p1788_p4), %s1690_s19, 3  ;;  %s1541_s22 = sshll.u32 (%p1788_p4), %s340_s15, 8 }
  0x16   : > { %s1814_s28 = scalar_lea.vmem (%p1788_p4), %s2458_s0, %s1542_s16  ;;  %s1819_s19 = scalar_lea.vmem (%p1788_p4), [#allocation3], %s1541_s22 }
  0x17   : > { %v435_v0 = vld [vmem:[%s1814_s28] sm:$0xff] (%p1788_p4)  ;;  %v437_v1 = vld [vmem:[%s1814_s28 + $0x10] sm:$0xff] (%p1788_p4) }
  0x18   : > { %v439_v2 = vld [vmem:[%s1814_s28 + $0x20] sm:$0xff] (%p1788_p4)  ;;  %436 = vst [vmem:[%s1819_s19] sm:$0xff] (%p1788_p4), %v435_v0  ;;  %v441_v3 = vld [vmem:[%s1814_s28 + $0x30] sm:$0xff] (%p1788_p4) }
  0x19   : > { %438 = vst [vmem:[%s1819_s19 + $0x8] sm:$0xff] %v437_v1  ;;  %v443_v4 = vld [vmem:[%s1814_s28 + $0x40] sm:$0xff]  ;;  %v445_v5 = vld [vmem:[%s1814_s28 + $0x50] sm:$0xff] }
  0x1a   : > { %440 = vst [vmem:[%s1819_s19 + $0x10] sm:$0xff] %v439_v2  ;;  %v447_v6 = vld [vmem:[%s1814_s28 + $0x60] sm:$0xff]  ;;  %v449_v7 = vld [vmem:[%s1814_s28 + $0x70] sm:$0xff] }
  0x1b   : > { %442 = vst [vmem:[%s1819_s19 + $0x18] sm:$0xff] %v441_v3  ;;  %v451_v8 = vld [vmem:[%s1814_s28 + $0x80] sm:$0xff]  ;;  %v453_v9 = vld [vmem:[%s1814_s28 + $0x90] sm:$0xff] }
  0x1c   : > { %444 = vst [vmem:[%s1819_s19 + $0x20] sm:$0xff] %v443_v4  ;;  %v455_v10 = vld [vmem:[%s1814_s28 + $0xa0] sm:$0xff]  ;;  %v457_v11 = vld [vmem:[%s1814_s28 + $0xb0] sm:$0xff] }
  0x1d   : > { %446 = vst [vmem:[%s1819_s19 + $0x28] sm:$0xff] %v445_v5  ;;  %v459_v12 = vld [vmem:[%s1814_s28 + $0xc0] sm:$0xff]  ;;  %v461_v13 = vld [vmem:[%s1814_s28 + $0xd0] sm:$0xff] }
  0x1e   : > { %448 = vst [vmem:[%s1819_s19 + $0x30] sm:$0xff] %v447_v6  ;;  %v463_v14 = vld [vmem:[%s1814_s28 + $0xe0] sm:$0xff]  ;;  %v465_v15 = vld [vmem:[%s1814_s28 + $0xf0] sm:$0xff] }
  0x1f   : > { %450 = vst [vmem:[%s1819_s19 + $0x38] sm:$0xff] %v449_v7  ;;  %v467_v16 = vld [vmem:[%s1814_s28 + $0x100] sm:$0xff]  ;;  %v469_v17 = vld [vmem:[%s1814_s28 + $0x110] sm:$0xff] }
  0x20   : > { %452 = vst [vmem:[%s1819_s19 + $0x40] sm:$0xff] %v451_v8  ;;  %v471_v18 = vld [vmem:[%s1814_s28 + $0x120] sm:$0xff]  ;;  %v473_v19 = vld [vmem:[%s1814_s28 + $0x130] sm:$0xff] }
  0x21   : > { %454 = vst [vmem:[%s1819_s19 + $0x48] sm:$0xff] %v453_v9  ;;  %v475_v20 = vld [vmem:[%s1814_s28 + $0x140] sm:$0xff]  ;;  %v477_v21 = vld [vmem:[%s1814_s28 + $0x150] sm:$0xff] }
  0x22   : > { %456 = vst [vmem:[%s1819_s19 + $0x50] sm:$0xff] %v455_v10  ;;  %v479_v22 = vld [vmem:[%s1814_s28 + $0x160] sm:$0xff]  ;;  %v481_v23 = vld [vmem:[%s1814_s28 + $0x170] sm:$0xff] }
  0x23   : > { %458 = vst [vmem:[%s1819_s19 + $0x58] sm:$0xff] %v457_v11  ;;  %v483_v24 = vld [vmem:[%s1814_s28 + $0x180] sm:$0xff]  ;;  %v485_v25 = vld [vmem:[%s1814_s28 + $0x190] sm:$0xff] }
  0x24   : > { %460 = vst [vmem:[%s1819_s19 + $0x60] sm:$0xff] %v459_v12  ;;  %v487_v26 = vld [vmem:[%s1814_s28 + $0x1a0] sm:$0xff]  ;;  %v489_v27 = vld [vmem:[%s1814_s28 + $0x1b0] sm:$0xff] }
  0x25   : > { %462 = vst [vmem:[%s1819_s19 + $0x68] sm:$0xff] %v461_v13  ;;  %v491_v28 = vld [vmem:[%s1814_s28 + $0x1c0] sm:$0xff]  ;;  %v493_v29 = vld [vmem:[%s1814_s28 + $0x1d0] sm:$0xff] }
  0x26   : > { %464 = vst [vmem:[%s1819_s19 + $0x70] sm:$0xff] %v463_v14  ;;  %v495_v30 = vld [vmem:[%s1814_s28 + $0x1e0] sm:$0xff]  ;;  %v497_v31 = vld [vmem:[%s1814_s28 + $0x1f0] sm:$0xff] }
  0x27   : > { %466 = vst [vmem:[%s1819_s19 + $0x78] sm:$0xff] %v465_v15 }
  0x28   : > { %468 = vst [vmem:[%s1819_s19 + $0x80] sm:$0xff] %v467_v16 }
  0x29   : > { %470 = vst [vmem:[%s1819_s19 + $0x88] sm:$0xff] %v469_v17 }
  0x2a   : > { %472 = vst [vmem:[%s1819_s19 + $0x90] sm:$0xff] %v471_v18 }
  0x2b   : > { %474 = vst [vmem:[%s1819_s19 + $0x98] sm:$0xff] %v473_v19 }
  0x2c   : > { %476 = vst [vmem:[%s1819_s19 + $0xa0] sm:$0xff] %v475_v20 }
  0x2d   : > { %478 = vst [vmem:[%s1819_s19 + $0xa8] sm:$0xff] %v477_v21 }
  0x2e   : > { %480 = vst [vmem:[%s1819_s19 + $0xb0] sm:$0xff] %v479_v22 }
  0x2f   : > { %482 = vst [vmem:[%s1819_s19 + $0xb8] sm:$0xff] %v481_v23 }
  0x30   : > { %484 = vst [vmem:[%s1819_s19 + $0xc0] sm:$0xff] %v483_v24 }
  0x31   : > { %486 = vst [vmem:[%s1819_s19 + $0xc8] sm:$0xff] %v485_v25 }
  0x32   : > { %488 = vst [vmem:[%s1819_s19 + $0xd0] sm:$0xff] %v487_v26 }
  0x33   : > { %490 = vst [vmem:[%s1819_s19 + $0xd8] sm:$0xff] %v489_v27 }
  0x34   : > { %492 = vst [vmem:[%s1819_s19 + $0xe0] sm:$0xff] %v491_v28 }
  0x35   : > { %494 = vst [vmem:[%s1819_s19 + $0xe8] sm:$0xff] %v493_v29 }
  0x36   : > { %496 = vst [vmem:[%s1819_s19 + $0xf0] sm:$0xff] %v495_v30 }
  0x37   : > { %498 = vst [vmem:[%s1819_s19 + $0xf8] sm:$0xff] %v497_v31 }
  0x38 PF: > { %507 = sbr.rel (%p1795_p8) target bundleno = 717 (0x2cd), region = 98  ;;  %s510_s25 = sand.u32 (!%p1795_p8), 1, %s1682_s17  }
  0x39   : > { %s1544_s29 = sshll.u32 (!%p1795_p8), %s510_s25, 8 }
  0x3a   : > { %s1885_s30 = scalar_lea.vmem (!%p1795_p8), [#allocation3], %s1544_s29 }
  0x3d   : > { %1673 = dma.done.wait (%p1565_p7), [#allocation5], 16384  }
  0x3e   : > { %1675 = vsyncadd (%p1565_p7), [#allocation5], 4294950912  ;;  %552 = sbr.rel (%p1539_p6) target bundleno = 69 (0x45), region = 110 }
  0x43   : > { %vm553_vm0 = vcmask 519168   ;;  %v1695_v32 = vmov 0.0  }
  0x44   : > { %554 = vst.msk [vmem:[#allocation2] sm:$0xf] %vm553_vm0, %v1695_v32 }
  0x45 PF: > { %v560_v33 = vld [vmem:[%s1885_s30 + $0x20] sm:$0xff]  ;;  %v558_v34 = vld [vmem:[%s1885_s30 + $0x10] sm:$0xff]  ;;  %v561_v36 = vld [vmem:[%s1885_s30 + $0x28] sm:$0xff]  ;;  %v684_v1 = vlaneseq  ;;  %vm689_vm1 = vcmask 130112   ;;  %vm693_vm2 = vcmask 195712   ;;  %vm697_vm3 = vcmask 261312  }
  0x46   : > { %v556_v35 = vld [vmem:[%s1885_s30] sm:$0xff]  ;;  %596 = vadd.xlane.f32.xlu2 %v560_v33  ;;  %592 = vadd.xlane.f32.xlu1 %v558_v34  ;;  %v559_v37 = vld [vmem:[%s1885_s30 + $0x18] sm:$0xff]  ;;  %v557_v38 = vld [vmem:[%s1885_s30 + $0x8] sm:$0xff]  ;;  %vm701_vm4 = vcmask 326912   ;;  %vm705_vm5 = vcmask 392512   ;;  %vm709_vm6 = vcmask 458112  }
  0x47   : > { %588 = vadd.xlane.f32.xlu0 %v556_v35  ;;  %v564_v39 = vld [vmem:[%s1885_s30 + $0x40] sm:$0xff]  ;;  %v563_v40 = vld [vmem:[%s1885_s30 + $0x38] sm:$0xff]  ;;  %v562_v41 = vld [vmem:[%s1885_s30 + $0x30] sm:$0xff]  ;;  %v1925_v5 = vand.u32 127, %v684_v1  ;;  %vm713_vm7 = vcmask 523712   ;;  %vm760_vm8 = vcmask 1041409  }
  0x48   : > { %v567_v42 = vld [vmem:[%s1885_s30 + $0x58] sm:$0xff]  ;;  %v566_v43 = vld [vmem:[%s1885_s30 + $0x50] sm:$0xff]  ;;  %v565_v44 = vld [vmem:[%s1885_s30 + $0x48] sm:$0xff]  ;;  %vm762_vm9 = vcmask 1042434   ;;  %vm764_vm10 = vcmask 1043459   ;;  %vm768_vm11 = vcmask 519168  }
  0x49   : > { %v570_v45 = vld [vmem:[%s1885_s30 + $0x70] sm:$0xff]  ;;  %v569_v46 = vld [vmem:[%s1885_s30 + $0x68] sm:$0xff]  ;;  %v568_v47 = vld [vmem:[%s1885_s30 + $0x60] sm:$0xff]  ;;  %v1928_v6 = vadd.s32 4294967272, %v1925_v5  ;;  %v1931_v7 = vadd.s32 4294967288, %v1925_v5  ;;  %v1934_v8 = vadd.s32 4294967280, %v1925_v5 }
  0x4a   : > { %v574_v48 = vld [vmem:[%s1885_s30 + $0x90] sm:$0xff]  ;;  %v573_v49 = vld [vmem:[%s1885_s30 + $0x88] sm:$0xff]  ;;  %v572_v50 = vld [vmem:[%s1885_s30 + $0x80] sm:$0xff]  ;;  %v1939_v11 = vadd.s32 4294967264, %v1925_v5  ;;  %v711_v1 = vadd.s32 4294967240, %v1925_v5  ;;  %p1547_p12 = scmp.ne.s32.totalorder %s1773_s20, 1 }
  0x4b   : > { %v575_v51 = vld [vmem:[%s1885_s30 + $0x98] sm:$0xff]  ;;  %v581_v52 = vld [vmem:[%s1885_s30 + $0xc8] sm:$0xff]  ;;  %v580_v53 = vld [vmem:[%s1885_s30 + $0xc0] sm:$0xff] }
  0x4c   : > { %v583_v54 = vld [vmem:[%s1885_s30 + $0xd8] sm:$0xff]  ;;  %v576_v55 = vld [vmem:[%s1885_s30 + $0xa0] sm:$0xff]  ;;  %v582_v56 = vld [vmem:[%s1885_s30 + $0xd0] sm:$0xff] }
  0x4d   : > { %v571_v57 = vld [vmem:[%s1885_s30 + $0x78] sm:$0xff]  ;;  %v584_v58 = vld [vmem:[%s1885_s30 + $0xe0] sm:$0xff]  ;;  %v577_v59 = vld [vmem:[%s1885_s30 + $0xa8] sm:$0xff] }
  0x4e   : > { %598 = vadd.xlane.f32.xlu2 %v561_v36  ;;  %594 = vadd.xlane.f32.xlu1 %v559_v37  ;;  %v585_v60 = vld [vmem:[%s1885_s30 + $0xe8] sm:$0xff]  ;;  %v579_v61 = vld [vmem:[%s1885_s30 + $0xb8] sm:$0xff]  ;;  %v578_v62 = vld [vmem:[%s1885_s30 + $0xb0] sm:$0xff] }
  0x4f   : > { %590 = vadd.xlane.f32.xlu0 %v557_v38  ;;  %v587_v63 = vld [vmem:[%s1885_s30 + $0xf8] sm:$0xff]  ;;  %v586_v0 = vld [vmem:[%s1885_s30 + $0xf0] sm:$0xff] }
  0x56   : > { %604 = vadd.xlane.f32.xlu2 %v564_v39  ;;  %602 = vadd.xlane.f32.xlu1 %v563_v40 }
  0x57   : > { %600 = vadd.xlane.f32.xlu0 %v562_v41 }
  0x5e   : > { %610 = vadd.xlane.f32.xlu2 %v567_v42  ;;  %608 = vadd.xlane.f32.xlu1 %v566_v43 }
  0x5f   : > { %606 = vadd.xlane.f32.xlu0 %v565_v44 }
  0x66   : > { %616 = vadd.xlane.f32.xlu2 %v570_v45  ;;  %614 = vadd.xlane.f32.xlu1 %v569_v46 }
  0x67   : > { %612 = vadd.xlane.f32.xlu0 %v568_v47 }
  0x6e   : > { %624 = vadd.xlane.f32.xlu2 %v574_v48  ;;  %622 = vadd.xlane.f32.xlu1 %v573_v49 }
  0x6f   : > { %620 = vadd.xlane.f32.xlu0 %v572_v50 }
  0x76   : > { %626 = vadd.xlane.f32.xlu2 %v575_v51  ;;  %638 = vadd.xlane.f32.xlu1 %v581_v52  ;;  %v703_v52 = vadd.s32 4294967256, %v1925_v5 }
  0x77   : > { %636 = vadd.xlane.f32.xlu0 %v580_v53  ;;  %v707_v53 = vadd.s32 4294967248, %v1925_v5 }
  0x7e   : > { %642 = vadd.xlane.f32.xlu2 %v583_v54  ;;  %628 = vadd.xlane.f32.xlu1 %v576_v55 }
  0x7f   : > { %640 = vadd.xlane.f32.xlu0 %v582_v56 }
  0x86   : > { %618 = vadd.xlane.f32.xlu2 %v571_v57  ;;  %644 = vadd.xlane.f32.xlu1 %v584_v58 }
  0x87   : > { %630 = vadd.xlane.f32.xlu0 %v577_v59 }
  0x8e   : > { %646 = vadd.xlane.f32.xlu1 %v585_v60  ;;  %634 = vadd.xlane.f32.xlu2 %v579_v61 }
  0x8f   : > { %632 = vadd.xlane.f32.xlu0 %v578_v62 }
  0x96   : > { %650 = vadd.xlane.f32.xlu1 %v587_v63 }
  0x97   : > { %648 = vadd.xlane.f32.xlu0 %v586_v0 }
  0xb9   : > { %v597_v2 = vpop.xlane.xlu2 %596  ;;  %v593_v3 = vpop.xlane.xlu1 %592 }
  0xba   : > { %v589_v4 = vpop.xlane.xlu0 %588  ;;  %v692_v16 = vperm.slane %v593_v3, %v1934_v8  ;;  %v700_v18 = vperm.slane %v597_v2, %v1939_v11 }
  0xbb   : > { %v686_v13 = vperm.slane %v589_v4, %v1925_v5 }
  0xc1   : > { %v1936_v9 = vpop.xlane.xlu2 %598  ;;  %v595_v10 = vpop.xlane.xlu1 %594 }
  0xc2   : > { %v591_v12 = vpop.xlane.xlu0 %590  ;;  %v696_v14 = vperm.slane %v595_v10, %v1928_v6  ;;  %v704_v4 = vperm.slane %v1936_v9, %v703_v52 }
  0xc3   : > { %v688_v15 = vperm.slane %v591_v12, %v1931_v7 }
  0xc5   : > { %v690_v17 = vsel %vm689_vm1, %v688_v15, %v686_v13 }
  0xc6   : > { %v694_v19 = vsel %vm693_vm2, %v692_v16, %v690_v17 }
  0xc7   : > { %v698_v20 = vsel %vm697_vm3, %v696_v14, %v694_v19 }
  0xc8   : > { %v1950_v21 = vsel %vm701_vm4, %v700_v18, %v698_v20 }
  0xc9   : > { %v605_v22 = vpop.xlane.xlu2 %604  ;;  %v1952_v23 = vpop.xlane.xlu1 %602 }
  0xca   : > { %v1954_v24 = vpop.xlane.xlu0 %600  ;;  %v715_v40 = vperm.slane %v605_v22, %v1925_v5 }
  0xd1   : > { %v611_v25 = vpop.xlane.xlu2 %610  ;;  %v609_v26 = vpop.xlane.xlu1 %608 }
  0xd2   : > { %v607_v27 = vpop.xlane.xlu0 %606  ;;  %v718_v43 = vperm.slane %v609_v26, %v1934_v8  ;;  %v720_v47 = vperm.slane %v611_v25, %v1928_v6  ;;  %v706_v25 = vsel %vm705_vm5, %v704_v4, %v1950_v21 }
  0xd3   : > { %v716_v41 = vperm.slane %v607_v27, %v1931_v7 }
  0xd5   : > { %v717_v46 = vsel %vm689_vm1, %v716_v41, %v715_v40 }
  0xd6   : > { %v719_v50 = vsel %vm693_vm2, %v718_v43, %v717_v46 }
  0xd7   : > { %v721_v56 = vsel %vm697_vm3, %v720_v47, %v719_v50 }
  0xd9   : > { %v1956_v28 = vpop.xlane.xlu2 %616  ;;  %v615_v29 = vpop.xlane.xlu1 %614 }
  0xda   : > { %v613_v30 = vpop.xlane.xlu0 %612  ;;  %v724_v55 = vperm.slane %v615_v29, %v703_v52  ;;  %v726_v14 = vperm.slane %v1956_v28, %v707_v53 }
  0xdb   : > { %v722_v51 = vperm.slane %v613_v30, %v1939_v11 }
  0xdd   : > { %v723_v60 = vsel %vm701_vm4, %v722_v51, %v721_v56 }
  0xde   : > { %v725_v15 = vsel %vm705_vm5, %v724_v55, %v723_v60 }
  0xdf   : > { %v727_v28 = vsel %vm709_vm6, %v726_v14, %v725_v15 }
  0xe1   : > { %v625_v31 = vpop.xlane.xlu2 %624  ;;  %v623_v32 = vpop.xlane.xlu1 %622 }
  0xe2   : > { %v621_v33 = vpop.xlane.xlu0 %620  ;;  %v731_v48 = vperm.slane %v623_v32, %v1931_v7  ;;  %v733_v54 = vperm.slane %v625_v31, %v1934_v8 }
  0xe3   : > { %v730_v49 = vperm.slane %v621_v33, %v1925_v5 }
  0xe5   : > { %v732_v57 = vsel %vm689_vm1, %v731_v48, %v730_v49 }
  0xe6   : > { %v734_v10 = vsel %vm693_vm2, %v733_v54, %v732_v57 }
  0xe9   : > { %v627_v34 = vpop.xlane.xlu2 %626  ;;  %v639_v35 = vpop.xlane.xlu1 %638 }
  0xea   : > { %v637_v36 = vpop.xlane.xlu0 %636  ;;  %v735_v58 = vperm.slane %v627_v34, %v1928_v6  ;;  %v746_v61 = vperm.slane %v639_v35, %v1931_v7  ;;  %v708_v7 = vperm.slane %v1954_v24, %v707_v53  ;;  %v712_v24 = vperm.slane %v1952_v23, %v711_v1 }
  0xeb   : > { %v745_v62 = vperm.slane %v637_v36, %v1925_v5 }
  0xec   : > { %v736_v16 = vsel %vm697_vm3, %v735_v58, %v734_v10 }
  0xed   : > { %v747_v5 = vsel %vm689_vm1, %v746_v61, %v745_v62 }
  0xf1   : > { %v643_v37 = vpop.xlane.xlu2 %642  ;;  %v629_v38 = vpop.xlane.xlu1 %628 }
  0xf2   : > { %v641_v39 = vpop.xlane.xlu0 %640  ;;  %v737_v63 = vperm.slane %v629_v38, %v1939_v11  ;;  %v555_v38 = vld [vmem:[#allocation2] sm:$0xf] }
  0xf3   : > { %v748_v2 = vperm.slane %v641_v39, %v1934_v8  ;;  %v750_v8 = vperm.slane %v643_v37, %v1928_v6  ;;  %v710_v6 = vsel %vm709_vm6, %v708_v7, %v706_v25 }
  0xf4   : > { %v738_v17 = vsel %vm701_vm4, %v737_v63, %v736_v16  ;;  %v714_v34 = vsel %vm713_vm7, %v712_v24, %v710_v6 }
  0xf5   : > { %v749_v18 = vsel %vm693_vm2, %v748_v2, %v747_v5 }
  0xf6   : > { %v751_v30 = vsel %vm697_vm3, %v750_v8, %v749_v18 }
  0xf9   : > { %v645_v42 = vpop.xlane.xlu1 %644  ;;  %v619_v44 = vpop.xlane.xlu2 %618 }
  0xfa   : > { %v631_v45 = vpop.xlane.xlu0 %630  ;;  %v728_v9 = vperm.slane %v619_v44, %v711_v1  ;;  %v752_v19 = vperm.slane %v645_v42, %v1939_v11 }
  0xfb   : > { %v739_v3 = vperm.slane %v631_v45, %v703_v52 }
  0xfc   : > { %v729_v11 = vsel %vm713_vm7, %v728_v9, %v727_v28  ;;  %v753_v23 = vsel %vm701_vm4, %v752_v19, %v751_v30 }
  0xfd   : > { %v740_v20 = vsel %vm705_vm5, %v739_v3, %v738_v17  ;;  %v761_v36 = vsel %vm760_vm8, %v729_v11, %v714_v34 }
 0x101   : > { %v647_v59 = vpop.xlane.xlu1 %646  ;;  %v635_v13 = vpop.xlane.xlu2 %634 }
 0x102   : > { %v633_v0 = vpop.xlane.xlu0 %632  ;;  %v743_v22 = vperm.slane %v635_v13, %v711_v1  ;;  %v754_v26 = vperm.slane %v647_v59, %v703_v52 }
 0x103   : > { %v741_v12 = vperm.slane %v633_v0, %v707_v53 }
 0x104   : > { %v755_v35 = vsel %vm705_vm5, %v754_v26, %v753_v23 }
 0x105   : > { %v742_v27 = vsel %vm709_vm6, %v741_v12, %v740_v20 }
 0x106   : > { %v744_v21 = vsel %vm713_vm7, %v743_v22, %v742_v27 }
 0x107   : > { %v763_v39 = vsel %vm762_vm9, %v744_v21, %v761_v36 }
 0x109   : > { %v651_v29 = vpop.xlane.xlu1 %650 }
 0x10a   : > { %v649_v31 = vpop.xlane.xlu0 %648  ;;  %v758_v32 = vperm.slane %v651_v29, %v711_v1 }
 0x10b   : > { %v756_v33 = vperm.slane %v649_v31, %v707_v53 }
 0x10d   : > { %v757_v37 = vsel %vm709_vm6, %v756_v33, %v755_v35 }
 0x10e   : > { %v759_v40 = vsel %vm713_vm7, %v758_v32, %v757_v37  ;;  %773 = sbr.rel (%p1547_p12) target bundleno = 712 (0x2c8), region = 114 }
 0x10f   : > { %v765_v41 = vsel %vm764_vm10, %v759_v40, %v763_v39 }
 0x110   : > { %v767_v42 = vadd.f32 %v765_v41, %v555_v38 }
 0x112   : > { %769 = vst.msk [vmem:[#allocation2] sm:$0xf] %vm768_vm11, %v767_v42 }
 0x113   : > { %v783_v43 = vld [vmem:[%s2459_s1 + $0x38] sm:$0xff]  ;;  %v782_v44 = vld [vmem:[%s2459_s1 + $0x30] sm:$0xff]  ;;  %v781_v45 = vld [vmem:[%s2459_s1 + $0x28] sm:$0xff]  ;;  %vm788_vm12 = vcmask 523264  }
 0x114   : > { %800 = vmatpush.msra.mxu0 %v783_v43  ;;  %v945_v46 = vld [vmem:[%s2463_s5 + $0x3c0] sm:$0xff]  ;;  %v946_v47 = vld [vmem:[%s2463_s5 + $0x3c8] sm:$0xff]  ;;  %v947_v48 = vld [vmem:[%s2463_s5 + $0x3d0] sm:$0xff] }
 0x115   : > { %v780_v49 = vld [vmem:[%s2459_s1 + $0x20] sm:$0xff]  ;;  %971 = vmatpush.msra.mxu1 %v945_v46  ;;  %991 = vmatpush.msra.mxu2 %v946_v47  ;;  %v938_v51 = vld [vmem:[%s2463_s5 + $0x388] sm:$0xff]  ;;  %v939_v52 = vld [vmem:[%s2463_s5 + $0x390] sm:$0xff] }
 0x116   : > { %801 = vmatpush.msra.mxu0 %v782_v44  ;;  %v937_v50 = vld [vmem:[%s2463_s5 + $0x380] sm:$0xff]  ;;  %1011 = vmatpush.msra.mxu3 %v947_v48  ;;  %v779_v54 = vld [vmem:[%s2459_s1 + $0x18] sm:$0xff]  ;;  %v930_v55 = vld [vmem:[%s2463_s5 + $0x348] sm:$0xff] }
 0x117   : > { %v929_v53 = vld [vmem:[%s2463_s5 + $0x340] sm:$0xff]  ;;  %972 = vmatpush.msra.mxu1 %v937_v50  ;;  %992 = vmatpush.msra.mxu2 %v938_v51  ;;  %v931_v56 = vld [vmem:[%s2463_s5 + $0x350] sm:$0xff]  ;;  %v922_v58 = vld [vmem:[%s2463_s5 + $0x308] sm:$0xff] }
 0x118   : > { %802 = vmatpush.msra.mxu0 %v781_v45  ;;  %1012 = vmatpush.msra.mxu3 %v939_v52  ;;  %v921_v57 = vld [vmem:[%s2463_s5 + $0x300] sm:$0xff]  ;;  %v778_v59 = vld [vmem:[%s2459_s1 + $0x10] sm:$0xff]  ;;  %v914_v63 = vld [vmem:[%s2463_s5 + $0x2c8] sm:$0xff] }
 0x119   : > { %973 = vmatpush.msra.mxu1 %v929_v53  ;;  %993 = vmatpush.msra.mxu2 %v930_v55  ;;  %v923_v60 = vld [vmem:[%s2463_s5 + $0x310] sm:$0xff]  ;;  %v774_v61 = vld [vmem:[#allocation2] sm:$0xf]  ;;  %v913_v62 = vld [vmem:[%s2463_s5 + $0x2c0] sm:$0xff] }
 0x11a   : > { %803 = vmatpush.msra.mxu0 %v780_v49  ;;  %1013 = vmatpush.msra.mxu3 %v931_v56  ;;  %v777_v0 = vld [vmem:[%s2459_s1 + $0x8] sm:$0xff]  ;;  %v915_v1 = vld [vmem:[%s2463_s5 + $0x2d0] sm:$0xff]  ;;  %v905_v2 = vld [vmem:[%s2463_s5 + $0x280] sm:$0xff]  ;;  %v775_v10 = vmul.f32 0.00390625, %v774_v61 }
 0x11b   : > { %974 = vmatpush.msra.mxu1 %v921_v57  ;;  %994 = vmatpush.msra.mxu2 %v922_v58  ;;  %v906_v3 = vld [vmem:[%s2463_s5 + $0x288] sm:$0xff]  ;;  %v776_v4 = vld [vmem:[%s2459_s1] sm:$0xff]  ;;  %v907_v12 = vld [vmem:[%s2463_s5 + $0x290] sm:$0xff] }
 0x11c   : > { %804 = vmatpush.msra.mxu0 %v779_v54  ;;  %1014 = vmatpush.msra.mxu3 %v923_v60  ;;  %v897_v13 = vld [vmem:[%s2463_s5 + $0x240] sm:$0xff]  ;;  %v948_v7 = vld [vmem:[%s2463_s5 + $0x3d8] sm:$0xff]  ;;  %v898_v14 = vld [vmem:[%s2463_s5 + $0x248] sm:$0xff] }
 0x11d   : > { %975 = vmatpush.msra.mxu1 %v913_v62  ;;  %995 = vmatpush.msra.mxu2 %v914_v63  ;;  %v899_v15 = vld [vmem:[%s2463_s5 + $0x250] sm:$0xff]  ;;  %v889_v16 = vld [vmem:[%s2463_s5 + $0x200] sm:$0xff]  ;;  %v940_v5 = vld [vmem:[%s2463_s5 + $0x398] sm:$0xff] }
 0x11e   : > { %805 = vmatpush.msra.mxu0 %v778_v59  ;;  %1015 = vmatpush.msra.mxu3 %v915_v1  ;;  %v890_v8 = vld [vmem:[%s2463_s5 + $0x208] sm:$0xff]  ;;  %v891_v17 = vld [vmem:[%s2463_s5 + $0x210] sm:$0xff]  ;;  %v881_v9 = vld [vmem:[%s2463_s5 + $0x1c0] sm:$0xff] }
 0x11f   : > { %976 = vmatpush.msra.mxu1 %v905_v2  ;;  %996 = vmatpush.msra.mxu2 %v906_v3  ;;  %v932_v18 = vld [vmem:[%s2463_s5 + $0x358] sm:$0xff]  ;;  %v882_v19 = vld [vmem:[%s2463_s5 + $0x1c8] sm:$0xff]  ;;  %v883_v20 = vld [vmem:[%s2463_s5 + $0x1d0] sm:$0xff] }
 0x120   : > { %806 = vmatpush.msra.mxu0 %v777_v0  ;;  %1016 = vmatpush.msra.mxu3 %v907_v12  ;;  %v873_v22 = vld [vmem:[%s2463_s5 + $0x180] sm:$0xff]  ;;  %v924_v24 = vld [vmem:[%s2463_s5 + $0x318] sm:$0xff]  ;;  %v874_v25 = vld [vmem:[%s2463_s5 + $0x188] sm:$0xff] }
 0x121   : > { %977 = vmatpush.msra.mxu1 %v897_v13  ;;  %997 = vmatpush.msra.mxu2 %v898_v14  ;;  %v875_v26 = vld [vmem:[%s2463_s5 + $0x190] sm:$0xff]  ;;  %v865_v27 = vld [vmem:[%s2463_s5 + $0x140] sm:$0xff]  ;;  %v916_v6 = vld [vmem:[%s2463_s5 + $0x2d8] sm:$0xff] }
 0x122   : > { %807 = vmatpush.msra.mxu0 %v776_v4  ;;  %1017 = vmatpush.msra.mxu3 %v899_v15  ;;  %v866_v28 = vld [vmem:[%s2463_s5 + $0x148] sm:$0xff]  ;;  %v867_v29 = vld [vmem:[%s2463_s5 + $0x150] sm:$0xff]  ;;  %v857_v11 = vld [vmem:[%s2463_s5 + $0x100] sm:$0xff] }
 0x123   : > { %1548 = vmatmul.msk.f32.vlgmr.msra.gmra.mxu0 %vm788_vm12, %v775_v10  ;;  %978 = vmatpush.msra.mxu1 %v889_v16  ;;  %v908_v30 = vld [vmem:[%s2463_s5 + $0x298] sm:$0xff]  ;;  %v858_v31 = vld [vmem:[%s2463_s5 + $0x108] sm:$0xff]  ;;  %v859_v32 = vld [vmem:[%s2463_s5 + $0x110] sm:$0xff] }
 0x124   : > { %1031 = vmatpush.msrb.mxu0 %v948_v7  ;;  %998 = vmatpush.msra.mxu2 %v890_v8  ;;  %v849_v23 = vld [vmem:[%s2463_s5 + $0xc0] sm:$0xff]  ;;  %v900_v21 = vld [vmem:[%s2463_s5 + $0x258] sm:$0xff]  ;;  %v850_v33 = vld [vmem:[%s2463_s5 + $0xc8] sm:$0xff] }
 0x125   : > { %1018 = vmatpush.msra.mxu3 %v891_v17  ;;  %979 = vmatpush.msra.mxu1 %v881_v9  ;;  %v851_v34 = vld [vmem:[%s2463_s5 + $0xd0] sm:$0xff]  ;;  %v841_v35 = vld [vmem:[%s2463_s5 + $0x80] sm:$0xff]  ;;  %v892_v36 = vld [vmem:[%s2463_s5 + $0x218] sm:$0xff] }
 0x126   : > { %1032 = vmatpush.msrb.mxu0 %v940_v5  ;;  %999 = vmatpush.msra.mxu2 %v882_v19  ;;  %v842_v37 = vld [vmem:[%s2463_s5 + $0x88] sm:$0xff]  ;;  %v843_v38 = vld [vmem:[%s2463_s5 + $0x90] sm:$0xff]  ;;  %v833_v39 = vld [vmem:[%s2463_s5 + $0x40] sm:$0xff] }
 0x127   : > { %1019 = vmatpush.msra.mxu3 %v883_v20  ;;  %980 = vmatpush.msra.mxu1 %v873_v22  ;;  %v884_v40 = vld [vmem:[%s2463_s5 + $0x1d8] sm:$0xff]  ;;  %v834_v42 = vld [vmem:[%s2463_s5 + $0x48] sm:$0xff]  ;;  %v835_v43 = vld [vmem:[%s2463_s5 + $0x50] sm:$0xff] }
 0x128   : > { %1033 = vmatpush.msrb.mxu0 %v932_v18  ;;  %1000 = vmatpush.msra.mxu2 %v874_v25  ;;  %v876_v41 = vld [vmem:[%s2463_s5 + $0x198] sm:$0xff]  ;;  %v825_v44 = vld [vmem:[%s2463_s5] sm:$0xff]  ;;  %v826_v45 = vld [vmem:[%s2463_s5 + $0x8] sm:$0xff] }
 0x129   : > { %1020 = vmatpush.msra.mxu3 %v875_v26  ;;  %981 = vmatpush.msra.mxu1 %v865_v27  ;;  %v827_v46 = vld [vmem:[%s2463_s5 + $0x10] sm:$0xff]  ;;  %v949_v47 = vld [vmem:[%s2463_s5 + $0x3e0] sm:$0xff]  ;;  %v868_v48 = vld [vmem:[%s2463_s5 + $0x158] sm:$0xff] }
 0x12a   : > { %1034 = vmatpush.msrb.mxu0 %v924_v24  ;;  %1001 = vmatpush.msra.mxu2 %v866_v28  ;;  %v950_v49 = vld [vmem:[%s2463_s5 + $0x3e8] sm:$0xff]  ;;  %v951_v50 = vld [vmem:[%s2463_s5 + $0x3f0] sm:$0xff]  ;;  %v941_v51 = vld [vmem:[%s2463_s5 + $0x3a0] sm:$0xff] }
 0x12b   : > { %1021 = vmatpush.msra.mxu3 %v867_v29  ;;  %982 = vmatpush.msra.mxu1 %v857_v11  ;;  %v860_v52 = vld [vmem:[%s2463_s5 + $0x118] sm:$0xff]  ;;  %v942_v53 = vld [vmem:[%s2463_s5 + $0x3a8] sm:$0xff]  ;;  %v943_v54 = vld [vmem:[%s2463_s5 + $0x3b0] sm:$0xff] }
 0x12c   : > { %1035 = vmatpush.msrb.mxu0 %v916_v6  ;;  %1002 = vmatpush.msra.mxu2 %v858_v31  ;;  %v933_v55 = vld [vmem:[%s2463_s5 + $0x360] sm:$0xff]  ;;  %v852_v56 = vld [vmem:[%s2463_s5 + $0xd8] sm:$0xff]  ;;  %v934_v57 = vld [vmem:[%s2463_s5 + $0x368] sm:$0xff] }
 0x12d   : > { %1022 = vmatpush.msra.mxu3 %v859_v32  ;;  %983 = vmatpush.msra.mxu1 %v849_v23  ;;  %v935_v58 = vld [vmem:[%s2463_s5 + $0x370] sm:$0xff]  ;;  %v925_v59 = vld [vmem:[%s2463_s5 + $0x320] sm:$0xff]  ;;  %v844_v60 = vld [vmem:[%s2463_s5 + $0x98] sm:$0xff] }
 0x12e   : > { %1036 = vmatpush.msrb.mxu0 %v908_v30  ;;  %1003 = vmatpush.msra.mxu2 %v850_v33  ;;  %v926_v61 = vld [vmem:[%s2463_s5 + $0x328] sm:$0xff]  ;;  %v927_v62 = vld [vmem:[%s2463_s5 + $0x330] sm:$0xff]  ;;  %v917_v63 = vld [vmem:[%s2463_s5 + $0x2e0] sm:$0xff] }
 0x12f   : > { %1023 = vmatpush.msra.mxu3 %v851_v34  ;;  %984 = vmatpush.msra.mxu1 %v841_v35  ;;  %v836_v0 = vld [vmem:[%s2463_s5 + $0x58] sm:$0xff]  ;;  %v918_v1 = vld [vmem:[%s2463_s5 + $0x2e8] sm:$0xff]  ;;  %v919_v2 = vld [vmem:[%s2463_s5 + $0x2f0] sm:$0xff] }
 0x130   : > { %1037 = vmatpush.msrb.mxu0 %v900_v21  ;;  %1004 = vmatpush.msra.mxu2 %v842_v37  ;;  %v909_v3 = vld [vmem:[%s2463_s5 + $0x2a0] sm:$0xff]  ;;  %v828_v4 = vld [vmem:[%s2463_s5 + $0x18] sm:$0xff]  ;;  %v910_v10 = vld [vmem:[%s2463_s5 + $0x2a8] sm:$0xff] }
 0x131   : > { %1024 = vmatpush.msra.mxu3 %v843_v38  ;;  %985 = vmatpush.msra.mxu1 %v833_v39  ;;  %v952_v12 = vld [vmem:[%s2463_s5 + $0x3f8] sm:$0xff]  ;;  %v911_v13 = vld [vmem:[%s2463_s5 + $0x2b0] sm:$0xff]  ;;  %v901_v8 = vld [vmem:[%s2463_s5 + $0x260] sm:$0xff] }
 0x132   : > { %1038 = vmatpush.msrb.mxu0 %v892_v36  ;;  %1005 = vmatpush.msra.mxu2 %v834_v42  ;;  %v944_v7 = vld [vmem:[%s2463_s5 + $0x3b8] sm:$0xff]  ;;  %v902_v17 = vld [vmem:[%s2463_s5 + $0x268] sm:$0xff]  ;;  %v903_v9 = vld [vmem:[%s2463_s5 + $0x270] sm:$0xff] }
 0x133   : > { %1025 = vmatpush.msra.mxu3 %v835_v43  ;;  %986 = vmatpush.msra.mxu1 %v825_v44  ;;  %v936_v14 = vld [vmem:[%s2463_s5 + $0x378] sm:$0xff]  ;;  %v893_v19 = vld [vmem:[%s2463_s5 + $0x220] sm:$0xff]  ;;  %v894_v20 = vld [vmem:[%s2463_s5 + $0x228] sm:$0xff] }
 0x134   : > { %1039 = vmatpush.msrb.mxu0 %v884_v40  ;;  %1006 = vmatpush.msra.mxu2 %v826_v45  ;;  %v928_v15 = vld [vmem:[%s2463_s5 + $0x338] sm:$0xff]  ;;  %v895_v22 = vld [vmem:[%s2463_s5 + $0x230] sm:$0xff]  ;;  %v885_v25 = vld [vmem:[%s2463_s5 + $0x1e0] sm:$0xff] }
 0x135   : > { %1026 = vmatpush.msra.mxu3 %v827_v46  ;;  %1051 = vmatpush.msrb.mxu1 %v949_v47  ;;  %v920_v16 = vld [vmem:[%s2463_s5 + $0x2f8] sm:$0xff]  ;;  %v886_v26 = vld [vmem:[%s2463_s5 + $0x1e8] sm:$0xff]  ;;  %v887_v27 = vld [vmem:[%s2463_s5 + $0x1f0] sm:$0xff] }
 0x136   : > { %1040 = vmatpush.msrb.mxu0 %v876_v41  ;;  %1071 = vmatpush.msrb.mxu2 %v950_v49  ;;  %v912_v5 = vld [vmem:[%s2463_s5 + $0x2b8] sm:$0xff]  ;;  %v877_v28 = vld [vmem:[%s2463_s5 + $0x1a0] sm:$0xff]  ;;  %v878_v29 = vld [vmem:[%s2463_s5 + $0x1a8] sm:$0xff] }
 0x137   : > { %1091 = vmatpush.msrb.mxu3 %v951_v50  ;;  %1052 = vmatpush.msrb.mxu1 %v941_v51  ;;  %v904_v18 = vld [vmem:[%s2463_s5 + $0x278] sm:$0xff]  ;;  %v879_v11 = vld [vmem:[%s2463_s5 + $0x1b0] sm:$0xff]  ;;  %v869_v31 = vld [vmem:[%s2463_s5 + $0x160] sm:$0xff] }
 0x138   : > { %1041 = vmatpush.msrb.mxu0 %v868_v48  ;;  %1072 = vmatpush.msrb.mxu2 %v942_v53  ;;  %v896_v24 = vld [vmem:[%s2463_s5 + $0x238] sm:$0xff]  ;;  %v870_v32 = vld [vmem:[%s2463_s5 + $0x168] sm:$0xff]  ;;  %v871_v23 = vld [vmem:[%s2463_s5 + $0x170] sm:$0xff] }
 0x139   : > { %1092 = vmatpush.msrb.mxu3 %v943_v54  ;;  %1053 = vmatpush.msrb.mxu1 %v933_v55  ;;  %v888_v6 = vld [vmem:[%s2463_s5 + $0x1f8] sm:$0xff]  ;;  %v861_v33 = vld [vmem:[%s2463_s5 + $0x120] sm:$0xff]  ;;  %v862_v34 = vld [vmem:[%s2463_s5 + $0x128] sm:$0xff] }
 0x13a   : > { %1042 = vmatpush.msrb.mxu0 %v860_v52  ;;  %1073 = vmatpush.msrb.mxu2 %v934_v57  ;;  %v880_v30 = vld [vmem:[%s2463_s5 + $0x1b8] sm:$0xff]  ;;  %v863_v35 = vld [vmem:[%s2463_s5 + $0x130] sm:$0xff]  ;;  %v853_v37 = vld [vmem:[%s2463_s5 + $0xe0] sm:$0xff] }
 0x13b   : > { %1093 = vmatpush.msrb.mxu3 %v935_v58  ;;  %1054 = vmatpush.msrb.mxu1 %v925_v59  ;;  %v872_v21 = vld [vmem:[%s2463_s5 + $0x178] sm:$0xff]  ;;  %v854_v38 = vld [vmem:[%s2463_s5 + $0xe8] sm:$0xff]  ;;  %v855_v39 = vld [vmem:[%s2463_s5 + $0xf0] sm:$0xff] }
 0x13c   : > { %1043 = vmatpush.msrb.mxu0 %v852_v56  ;;  %1074 = vmatpush.msrb.mxu2 %v926_v61  ;;  %v864_v36 = vld [vmem:[%s2463_s5 + $0x138] sm:$0xff]  ;;  %v845_v41 = vld [vmem:[%s2463_s5 + $0xa0] sm:$0xff]  ;;  %v846_v42 = vld [vmem:[%s2463_s5 + $0xa8] sm:$0xff] }
 0x13d   : > { %1094 = vmatpush.msrb.mxu3 %v927_v62  ;;  %1055 = vmatpush.msrb.mxu1 %v917_v63  ;;  %v856_v40 = vld [vmem:[%s2463_s5 + $0xf8] sm:$0xff]  ;;  %v847_v43 = vld [vmem:[%s2463_s5 + $0xb0] sm:$0xff]  ;;  %v837_v45 = vld [vmem:[%s2463_s5 + $0x60] sm:$0xff] }
 0x13e   : > { %1044 = vmatpush.msrb.mxu0 %v844_v60  ;;  %1075 = vmatpush.msrb.mxu2 %v918_v1  ;;  %v848_v44 = vld [vmem:[%s2463_s5 + $0xb8] sm:$0xff]  ;;  %v838_v46 = vld [vmem:[%s2463_s5 + $0x68] sm:$0xff]  ;;  %v839_v47 = vld [vmem:[%s2463_s5 + $0x70] sm:$0xff] }
 0x13f   : > { %1095 = vmatpush.msrb.mxu3 %v919_v2  ;;  %1056 = vmatpush.msrb.mxu1 %v909_v3  ;;  %v840_v48 = vld [vmem:[%s2463_s5 + $0x78] sm:$0xff]  ;;  %v829_v49 = vld [vmem:[%s2463_s5 + $0x20] sm:$0xff]  ;;  %v830_v50 = vld [vmem:[%s2463_s5 + $0x28] sm:$0xff] }
 0x140   : > { %1045 = vmatpush.msrb.mxu0 %v836_v0  ;;  %1076 = vmatpush.msrb.mxu2 %v910_v10  ;;  %v831_v51 = vld [vmem:[%s2463_s5 + $0x30] sm:$0xff]  ;;  %v832_v52 = vld [vmem:[%s2463_s5 + $0x38] sm:$0xff]  ;;  %v1598_v53 = vld [vmem:[%s2460_s2] ss:$0 sm:$0xff] }
 0x141   : > { %1096 = vmatpush.msrb.mxu3 %v911_v13  ;;  %1057 = vmatpush.msrb.mxu1 %v901_v8  ;;  %v1599_v54 = vld [vmem:[%s2461_s3] ss:$0 sm:$0xff]  ;;  %v1193_v63 = vld [vmem:[#allocation4 + $0x78] sm:$0xff]  ;;  %v1191_v13 = vld [vmem:[#allocation4 + $0x68] sm:$0xff] }
 0x142   : > { %1046 = vmatpush.msrb.mxu0 %v828_v4  ;;  %1077 = vmatpush.msrb.mxu2 %v902_v17  ;;  %v1600_v57 = vld [vmem:[%s2462_s4] ss:$0 sm:$0xff]  ;;  %v1241_v0 = vld [vmem:[#allocation4 + $0x1f8] sm:$0xff]  ;;  %v1206_v8 = vld [vmem:[#allocation4 + $0xe0] sm:$0xff] }
 0x143   : > { %1097 = vmatpush.msrb.mxu3 %v903_v9  ;;  %1058 = vmatpush.msrb.mxu1 %v893_v19  ;;  %v823_v60 = vld [vmem:[%s2467_s9] sm:$0xf]  ;;  %v1209_v1 = vld [vmem:[#allocation4 + $0xf8] sm:$0xff]  ;;  %v1222_v17 = vld [vmem:[#allocation4 + $0x160] sm:$0xff] }
 0x144   : > { %1111 = vmatpush.msra.mxu0 %v952_v12  ;;  %1078 = vmatpush.msrb.mxu2 %v894_v20  ;;  %v1225_v2 = vld [vmem:[#allocation4 + $0x178] sm:$0xff]  ;;  %v1192_v3 = vld [vmem:[#allocation4 + $0x70] sm:$0xff] }
 0x145   : > { %1098 = vmatpush.msrb.mxu3 %v895_v22  ;;  %1059 = vmatpush.msrb.mxu1 %v885_v25  ;;  %v1240_v4 = vld [vmem:[#allocation4 + $0x1f0] sm:$0xff]  ;;  %v1189_v9 = vld [vmem:[#allocation4 + $0x58] sm:$0xff] }
 0x146   : > { %1112 = vmatpush.msra.mxu0 %v944_v7  ;;  %1079 = vmatpush.msrb.mxu2 %v886_v26  ;;  %v1208_v10 = vld [vmem:[#allocation4 + $0xf0] sm:$0xff]  ;;  %v1239_v7 = vld [vmem:[#allocation4 + $0x1e8] sm:$0xff]  ;;  %v1205_v19 = vld [vmem:[#allocation4 + $0xd8] sm:$0xff] }
 0x147   : > { %1099 = vmatpush.msrb.mxu3 %v887_v27  ;;  %1060 = vmatpush.msrb.mxu1 %v877_v28  ;;  %v1224_v12 = vld [vmem:[#allocation4 + $0x170] sm:$0xff]  ;;  %v1221_v20 = vld [vmem:[#allocation4 + $0x158] sm:$0xff]  ;;  %v1187_v27 = vld [vmem:[#allocation4 + $0x48] sm:$0xff] }
 0x148   : > { %1113 = vmatpush.msra.mxu0 %v936_v14  ;;  %1080 = vmatpush.msrb.mxu2 %v878_v29  ;;  %v1207_v14 = vld [vmem:[#allocation4 + $0xe8] sm:$0xff]  ;;  %v1188_v22 = vld [vmem:[#allocation4 + $0x50] sm:$0xff] }
 0x149   : > { %1100 = vmatpush.msrb.mxu3 %v879_v11  ;;  %1061 = vmatpush.msrb.mxu1 %v869_v31  ;;  %v1204_v25 = vld [vmem:[#allocation4 + $0xd0] sm:$0xff]  ;;  %v1203_v28 = vld [vmem:[#allocation4 + $0xc8] sm:$0xff]  ;;  %v1186_v11 = vld [vmem:[#allocation4 + $0x40] sm:$0xff] }
 0x14a   : > { %1114 = vmatpush.msra.mxu0 %v928_v15  ;;  %1081 = vmatpush.msrb.mxu2 %v870_v32  ;;  %v1223_v15 = vld [vmem:[#allocation4 + $0x168] sm:$0xff]  ;;  %v1220_v26 = vld [vmem:[#allocation4 + $0x150] sm:$0xff]  ;;  %v1202_v31 = vld [vmem:[#allocation4 + $0xc0] sm:$0xff] }
 0x14b   : > { %1101 = vmatpush.msrb.mxu3 %v871_v23  ;;  %1062 = vmatpush.msrb.mxu1 %v861_v33  ;;  %v1219_v29 = vld [vmem:[#allocation4 + $0x148] sm:$0xff]  ;;  %v1218_v32 = vld [vmem:[#allocation4 + $0x140] sm:$0xff]  ;;  %v1185_v23 = vld [vmem:[#allocation4 + $0x38] sm:$0xff] }
 0x14c   : > { %1115 = vmatpush.msra.mxu0 %v920_v16  ;;  %1082 = vmatpush.msrb.mxu2 %v862_v34  ;;  %v1190_v16 = vld [vmem:[#allocation4 + $0x60] sm:$0xff]  ;;  %v1201_v33 = vld [vmem:[#allocation4 + $0xb8] sm:$0xff] }
 0x14d   : > { %1102 = vmatpush.msrb.mxu3 %v863_v35  ;;  %1063 = vmatpush.msrb.mxu1 %v853_v37  ;;  %v1217_v34 = vld [vmem:[#allocation4 + $0x138] sm:$0xff]  ;;  %v1184_v35 = vld [vmem:[#allocation4 + $0x30] sm:$0xff] }
 0x14e   : > { %1116 = vmatpush.msra.mxu0 %v912_v5  ;;  %1083 = vmatpush.msrb.mxu2 %v854_v38  ;;  %v1238_v5 = vld [vmem:[#allocation4 + $0x1e0] sm:$0xff]  ;;  %v1200_v37 = vld [vmem:[#allocation4 + $0xb0] sm:$0xff] }
 0x14f   : > { %1103 = vmatpush.msrb.mxu3 %v855_v39  ;;  %1064 = vmatpush.msrb.mxu1 %v845_v41  ;;  %v1216_v38 = vld [vmem:[#allocation4 + $0x130] sm:$0xff]  ;;  %v1183_v39 = vld [vmem:[#allocation4 + $0x28] sm:$0xff] }
 0x150   : > { %1117 = vmatpush.msra.mxu0 %v904_v18  ;;  %1084 = vmatpush.msrb.mxu2 %v846_v42  ;;  %v1237_v18 = vld [vmem:[#allocation4 + $0x1d8] sm:$0xff]  ;;  %v1199_v41 = vld [vmem:[#allocation4 + $0xa8] sm:$0xff] }
 0x151   : > { %1104 = vmatpush.msrb.mxu3 %v847_v43  ;;  %1065 = vmatpush.msrb.mxu1 %v837_v45  ;;  %v1215_v42 = vld [vmem:[#allocation4 + $0x128] sm:$0xff]  ;;  %v1182_v43 = vld [vmem:[#allocation4 + $0x20] sm:$0xff] }
 0x152   : > { %1118 = vmatpush.msra.mxu0 %v896_v24  ;;  %1085 = vmatpush.msrb.mxu2 %v838_v46  ;;  %v1236_v24 = vld [vmem:[#allocation4 + $0x1d0] sm:$0xff]  ;;  %v1198_v45 = vld [vmem:[#allocation4 + $0xa0] sm:$0xff] }
 0x153   : > { %1105 = vmatpush.msrb.mxu3 %v839_v47  ;;  %1066 = vmatpush.msrb.mxu1 %v829_v49  ;;  %v1214_v46 = vld [vmem:[#allocation4 + $0x120] sm:$0xff]  ;;  %v1181_v47 = vld [vmem:[#allocation4 + $0x18] sm:$0xff] }
 0x154   : > { %1119 = vmatpush.msra.mxu0 %v888_v6  ;;  %1086 = vmatpush.msrb.mxu2 %v830_v50  ;;  %v1235_v6 = vld [vmem:[#allocation4 + $0x1c8] sm:$0xff]  ;;  %v1197_v49 = vld [vmem:[#allocation4 + $0x98] sm:$0xff] }
 0x155   : > { %1106 = vmatpush.msrb.mxu3 %v831_v51  ;;  %v1213_v50 = vld [vmem:[#allocation4 + $0x118] sm:$0xff]  ;;  %v1180_v51 = vld [vmem:[#allocation4 + $0x10] sm:$0xff] }
 0x156   : > { %1120 = vmatpush.msra.mxu0 %v880_v30  ;;  %v1234_v30 = vld [vmem:[#allocation4 + $0x1c0] sm:$0xff] }
 0x158   : > { %1121 = vmatpush.msra.mxu0 %v872_v21  ;;  %v1233_v21 = vld [vmem:[#allocation4 + $0x1b8] sm:$0xff] }
 0x15a   : > { %1122 = vmatpush.msra.mxu0 %v864_v36  ;;  %v1232_v36 = vld [vmem:[#allocation4 + $0x1b0] sm:$0xff] }
 0x15c   : > { %1123 = vmatpush.msra.mxu0 %v856_v40  ;;  %v1231_v40 = vld [vmem:[#allocation4 + $0x1a8] sm:$0xff] }
 0x15e   : > { %1124 = vmatpush.msra.mxu0 %v848_v44  ;;  %v1230_v44 = vld [vmem:[#allocation4 + $0x1a0] sm:$0xff] }
 0x160   : > { %1125 = vmatpush.msra.mxu0 %v840_v48  ;;  %v1229_v48 = vld [vmem:[#allocation4 + $0x198] sm:$0xff] }
 0x162   : > { %1126 = vmatpush.msra.mxu0 %v832_v52  ;;  %v1228_v52 = vld [vmem:[#allocation4 + $0x190] sm:$0xff] }
 0x1a0   : > { %v809_v55 = vpop.f32.mrf.mxu0 }
 0x1a1   : > { %v810_v56 = vadd.f32 %v1598_v53, %v809_v55  ;;  %v1196_v53 = vld [vmem:[#allocation4 + $0x90] sm:$0xff]  ;;  %v1179_v55 = vld [vmem:[#allocation4 + $0x8] sm:$0xff] }
 0x1a3   : > { %v816_v58 = vmul.f32 %v1599_v54, %v810_v56  ;;  %v1212_v54 = vld [vmem:[#allocation4 + $0x110] sm:$0xff]  ;;  %v1227_v56 = vld [vmem:[#allocation4 + $0x188] sm:$0xff] }
 0x1a5   : > { %v821_v59 = vadd.f32 %v1600_v57, %v816_v58  ;;  %v1195_v57 = vld [vmem:[#allocation4 + $0x88] sm:$0xff] }
 0x1a6   : > { %v1211_v58 = vld [vmem:[#allocation4 + $0x108] sm:$0xff] }
 0x1a7   : > { %v822_v61 = vmax.f32 %v821_v59, 0.0  ;;  %v1178_v59 = vld [vmem:[#allocation4] sm:$0xff] }
 0x1a9   : > { %v824_v62 = vmul.f32 %v823_v60, %v822_v61  ;;  %v1226_v60 = vld [vmem:[#allocation4 + $0x180] sm:$0xff]  ;;  %v1257_v61 = vld [vmem:[#allocation4 + $0x278] sm:$0xff] }
 0x1ab   : > { %987 = vmatmul.f32.vlgmr.msra.gmra.mxu1 %v824_v62  ;;  %1007 = vmatmul.f32.vlgmr.msra.gmra.mxu2 %v824_v62 }
 0x1ac   : > { %1027 = vmatmul.f32.vlgmr.msra.gmra.mxu3 %v824_v62  ;;  %1047 = vmatmul.f32.vlgmr.msrb.gmra.mxu0 %v824_v62 }
 0x1ad   : > { %1310 = vmatpush.msra.mxu1 %v1193_v63  ;;  %1370 = vmatpush.msrb.mxu0 %v1241_v0  ;;  %v1194_v63 = vld [vmem:[#allocation4 + $0x80] sm:$0xff] }
 0x1ae   : > { %1330 = vmatpush.msra.mxu2 %v1209_v1  ;;  %1350 = vmatpush.msra.mxu3 %v1225_v2  ;;  %v1210_v0 = vld [vmem:[#allocation4 + $0x100] sm:$0xff]  ;;  %v1256_v1 = vld [vmem:[#allocation4 + $0x270] sm:$0xff] }
 0x1af   : > { %1311 = vmatpush.msra.mxu1 %v1192_v3  ;;  %1371 = vmatpush.msrb.mxu0 %v1240_v4  ;;  %v1304_v2 = vld [vmem:[#allocation4 + $0x3f0] sm:$0xff]  ;;  %v1273_v3 = vld [vmem:[#allocation4 + $0x2f8] sm:$0xff] }
 0x1b0   : > { %1331 = vmatpush.msra.mxu2 %v1208_v10  ;;  %1351 = vmatpush.msra.mxu3 %v1224_v12  ;;  %v1289_v4 = vld [vmem:[#allocation4 + $0x378] sm:$0xff]  ;;  %v1255_v10 = vld [vmem:[#allocation4 + $0x268] sm:$0xff] }
 0x1b1   : > { %1312 = vmatpush.msra.mxu1 %v1191_v13  ;;  %1372 = vmatpush.msrb.mxu0 %v1239_v7  ;;  %v1303_v12 = vld [vmem:[#allocation4 + $0x3e8] sm:$0xff]  ;;  %v1272_v13 = vld [vmem:[#allocation4 + $0x2f0] sm:$0xff] }
 0x1b2   : > { %1332 = vmatpush.msra.mxu2 %v1207_v14  ;;  %1352 = vmatpush.msra.mxu3 %v1223_v15  ;;  %v1288_v7 = vld [vmem:[#allocation4 + $0x370] sm:$0xff]  ;;  %v1254_v14 = vld [vmem:[#allocation4 + $0x260] sm:$0xff] }
 0x1b3   : > { %1067 = vmatmul.f32.vlgmr.msrb.gmra.mxu1 %v824_v62  ;;  %1087 = vmatmul.f32.vlgmr.msrb.gmra.mxu2 %v824_v62  ;;  %v1302_v15 = vld [vmem:[#allocation4 + $0x3e0] sm:$0xff] }
 0x1b4   : > { %1107 = vmatmul.f32.vlgmr.msrb.gmra.mxu3 %v824_v62  ;;  %1127 = vmatmul.f32.vlgmr.msra.gmra.mxu0 %v824_v62  ;;  %v1305_v62 = vld [vmem:[#allocation4 + $0x3f8] sm:$0xff] }
 0x1b5   : > { %1313 = vmatpush.msra.mxu1 %v1190_v16  ;;  %1373 = vmatpush.msrb.mxu0 %v1238_v5  ;;  %v1271_v16 = vld [vmem:[#allocation4 + $0x2e8] sm:$0xff] }
 0x1b6   : > { %1333 = vmatpush.msra.mxu2 %v1206_v8  ;;  %1353 = vmatpush.msra.mxu3 %v1222_v17  ;;  %v1287_v5 = vld [vmem:[#allocation4 + $0x368] sm:$0xff]  ;;  %v1253_v8 = vld [vmem:[#allocation4 + $0x258] sm:$0xff] }
 0x1b7   : > { %1314 = vmatpush.msra.mxu1 %v1189_v9  ;;  %1374 = vmatpush.msrb.mxu0 %v1237_v18  ;;  %v1301_v17 = vld [vmem:[#allocation4 + $0x3d8] sm:$0xff]  ;;  %v1270_v9 = vld [vmem:[#allocation4 + $0x2e0] sm:$0xff] }
 0x1b8   : > { %1334 = vmatpush.msra.mxu2 %v1205_v19  ;;  %1354 = vmatpush.msra.mxu3 %v1221_v20  ;;  %v1286_v18 = vld [vmem:[#allocation4 + $0x360] sm:$0xff]  ;;  %v1252_v19 = vld [vmem:[#allocation4 + $0x250] sm:$0xff] }
 0x1b9   : > { %1315 = vmatpush.msra.mxu1 %v1188_v22  ;;  %1375 = vmatpush.msrb.mxu0 %v1236_v24  ;;  %v1300_v20 = vld [vmem:[#allocation4 + $0x3d0] sm:$0xff]  ;;  %v1269_v22 = vld [vmem:[#allocation4 + $0x2d8] sm:$0xff] }
 0x1ba   : > { %1335 = vmatpush.msra.mxu2 %v1204_v25  ;;  %1355 = vmatpush.msra.mxu3 %v1220_v26  ;;  %v1285_v24 = vld [vmem:[#allocation4 + $0x358] sm:$0xff]  ;;  %v1251_v25 = vld [vmem:[#allocation4 + $0x248] sm:$0xff] }
 0x1bb   : > { %1316 = vmatpush.msra.mxu1 %v1187_v27  ;;  %1376 = vmatpush.msrb.mxu0 %v1235_v6  ;;  %v1299_v26 = vld [vmem:[#allocation4 + $0x3c8] sm:$0xff]  ;;  %v1250_v27 = vld [vmem:[#allocation4 + $0x240] sm:$0xff] }
 0x1bc   : > { %1336 = vmatpush.msra.mxu2 %v1203_v28  ;;  %1356 = vmatpush.msra.mxu3 %v1219_v29  ;;  %v1298_v6 = vld [vmem:[#allocation4 + $0x3c0] sm:$0xff]  ;;  %v1139_v28 = vld [vmem:[%s2468_s10] sm:$0xff] }
 0x1bd   : > { %1317 = vmatpush.msra.mxu1 %v1186_v11  ;;  %1377 = vmatpush.msrb.mxu0 %v1234_v30  ;;  %v1140_v29 = vld [vmem:[%s2468_s10 + $0x8] sm:$0xff]  ;;  %1147 = vst [vmem:[#allocation1] ss:$2 sm:$0xff] %v1139_v28  ;;  %v1268_v30 = vld [vmem:[#allocation4 + $0x2d0] sm:$0xff] }
 0x1be   : > { %1337 = vmatpush.msra.mxu2 %v1202_v31  ;;  %1357 = vmatpush.msra.mxu3 %v1218_v32  ;;  %1149 = vst [vmem:[#allocation1 + $0x10] ss:$2 sm:$0xff] %v1140_v29  ;;  %v1249_v11 = vld [vmem:[#allocation4 + $0x238] sm:$0xff]  ;;  %v1284_v31 = vld [vmem:[#allocation4 + $0x350] sm:$0xff] }
 0x1bf   : > { %1318 = vmatpush.msra.mxu1 %v1185_v23  ;;  %1378 = vmatpush.msrb.mxu0 %v1233_v21  ;;  %v1297_v32 = vld [vmem:[#allocation4 + $0x3b8] sm:$0xff]  ;;  %v1248_v23 = vld [vmem:[#allocation4 + $0x230] sm:$0xff]  ;;  %v1267_v21 = vld [vmem:[#allocation4 + $0x2c8] sm:$0xff] }
 0x1c0   : > { %1338 = vmatpush.msra.mxu2 %v1201_v33  ;;  %1358 = vmatpush.msra.mxu3 %v1217_v34  ;;  %v1283_v33 = vld [vmem:[#allocation4 + $0x348] sm:$0xff]  ;;  %v1296_v34 = vld [vmem:[#allocation4 + $0x3b0] sm:$0xff] }
 0x1c1   : > { %1319 = vmatpush.msra.mxu1 %v1184_v35  ;;  %1379 = vmatpush.msrb.mxu0 %v1232_v36  ;;  %v1247_v35 = vld [vmem:[#allocation4 + $0x228] sm:$0xff]  ;;  %v1266_v36 = vld [vmem:[#allocation4 + $0x2c0] sm:$0xff] }
 0x1c2   : > { %1339 = vmatpush.msra.mxu2 %v1200_v37  ;;  %1359 = vmatpush.msra.mxu3 %v1216_v38  ;;  %v1282_v37 = vld [vmem:[#allocation4 + $0x340] sm:$0xff]  ;;  %v1295_v38 = vld [vmem:[#allocation4 + $0x3a8] sm:$0xff] }
 0x1c3   : > { %1320 = vmatpush.msra.mxu1 %v1183_v39  ;;  %1380 = vmatpush.msrb.mxu0 %v1231_v40  ;;  %v1141_v39 = vld [vmem:[%s2468_s10 + $0x10] sm:$0xff] }
 0x1c4   : > { %1340 = vmatpush.msra.mxu2 %v1199_v41  ;;  %1360 = vmatpush.msra.mxu3 %v1215_v42  ;;  %v1246_v40 = vld [vmem:[#allocation4 + $0x220] sm:$0xff]  ;;  %v1265_v41 = vld [vmem:[#allocation4 + $0x2b8] sm:$0xff]  ;;  %1151 = vst [vmem:[#allocation1 + $0x20] ss:$2 sm:$0xff] %v1141_v39 }
 0x1c5   : > { %1321 = vmatpush.msra.mxu1 %v1182_v43  ;;  %1381 = vmatpush.msrb.mxu0 %v1230_v44  ;;  %v1281_v42 = vld [vmem:[#allocation4 + $0x338] sm:$0xff]  ;;  %v1294_v43 = vld [vmem:[#allocation4 + $0x3a0] sm:$0xff]  ;;  %v1142_v44 = vld [vmem:[%s2468_s10 + $0x18] sm:$0xff] }
 0x1c6   : > { %1341 = vmatpush.msra.mxu2 %v1198_v45  ;;  %1361 = vmatpush.msra.mxu3 %v1214_v46  ;;  %v1245_v45 = vld [vmem:[#allocation4 + $0x218] sm:$0xff]  ;;  %v1264_v46 = vld [vmem:[#allocation4 + $0x2b0] sm:$0xff]  ;;  %1153 = vst [vmem:[#allocation1 + $0x30] ss:$2 sm:$0xff] %v1142_v44 }
 0x1c7   : > { %1322 = vmatpush.msra.mxu1 %v1181_v47  ;;  %1382 = vmatpush.msrb.mxu0 %v1229_v48  ;;  %v1280_v47 = vld [vmem:[#allocation4 + $0x330] sm:$0xff]  ;;  %v1293_v48 = vld [vmem:[#allocation4 + $0x398] sm:$0xff] }
 0x1c8   : > { %1342 = vmatpush.msra.mxu2 %v1197_v49  ;;  %1362 = vmatpush.msra.mxu3 %v1213_v50  ;;  %v1244_v49 = vld [vmem:[#allocation4 + $0x210] sm:$0xff]  ;;  %v1263_v50 = vld [vmem:[#allocation4 + $0x2a8] sm:$0xff] }
 0x1c9   : > { %1323 = vmatpush.msra.mxu1 %v1180_v51  ;;  %1383 = vmatpush.msrb.mxu0 %v1228_v52  ;;  %v1279_v51 = vld [vmem:[#allocation4 + $0x328] sm:$0xff]  ;;  %v1292_v52 = vld [vmem:[#allocation4 + $0x390] sm:$0xff] }
 0x1ca   : > { %1343 = vmatpush.msra.mxu2 %v1196_v53  ;;  %1363 = vmatpush.msra.mxu3 %v1212_v54  ;;  %v1243_v53 = vld [vmem:[#allocation4 + $0x208] sm:$0xff]  ;;  %v1262_v54 = vld [vmem:[#allocation4 + $0x2a0] sm:$0xff] }
 0x1cb   : > { %1324 = vmatpush.msra.mxu1 %v1179_v55  ;;  %1384 = vmatpush.msrb.mxu0 %v1227_v56  ;;  %v1278_v55 = vld [vmem:[#allocation4 + $0x320] sm:$0xff]  ;;  %v1291_v56 = vld [vmem:[#allocation4 + $0x388] sm:$0xff] }
 0x1cc   : > { %1344 = vmatpush.msra.mxu2 %v1195_v57  ;;  %1364 = vmatpush.msra.mxu3 %v1211_v58  ;;  %v1242_v57 = vld [vmem:[#allocation4 + $0x200] sm:$0xff]  ;;  %v1261_v58 = vld [vmem:[#allocation4 + $0x298] sm:$0xff] }
 0x1cd   : > { %1325 = vmatpush.msra.mxu1 %v1178_v59  ;;  %1385 = vmatpush.msrb.mxu0 %v1226_v60  ;;  %v1277_v59 = vld [vmem:[#allocation4 + $0x318] sm:$0xff]  ;;  %v1290_v60 = vld [vmem:[#allocation4 + $0x380] sm:$0xff] }
 0x1ce   : > { %1345 = vmatpush.msra.mxu2 %v1194_v63  ;;  %1365 = vmatpush.msra.mxu3 %v1210_v0  ;;  %v1259_v63 = vld [vmem:[#allocation4 + $0x288] sm:$0xff] }
 0x1cf   : > { %1390 = vmatpush.msrb.mxu1 %v1257_v61  ;;  %1450 = vmatpush.msra.mxu0 %v1305_v62  ;;  %v1260_v61 = vld [vmem:[#allocation4 + $0x290] sm:$0xff]  ;;  %v1275_v0 = vld [vmem:[#allocation4 + $0x308] sm:$0xff] }
 0x1d0   : > { %1410 = vmatpush.msrb.mxu2 %v1273_v3  ;;  %1430 = vmatpush.msrb.mxu3 %v1289_v4  ;;  %v1276_v62 = vld [vmem:[#allocation4 + $0x310] sm:$0xff] }
 0x1d1   : > { %1391 = vmatpush.msrb.mxu1 %v1256_v1  ;;  %1451 = vmatpush.msra.mxu0 %v1304_v2  ;;  %v1258_v1 = vld [vmem:[#allocation4 + $0x280] sm:$0xff]  ;;  %v953_v3 = vld [vmem:[%s2464_s6] sm:$0xff] }
 0x1d2   : > { %1411 = vmatpush.msrb.mxu2 %v1272_v13  ;;  %1431 = vmatpush.msrb.mxu3 %v1288_v7  ;;  %v1274_v2 = vld [vmem:[#allocation4 + $0x300] sm:$0xff]  ;;  %v955_v4 = vperm.slane %v953_v3, 0  ;;  %v961_v39 = vperm.slane %v953_v3, 6 }
 0x1d3   : > { %1392 = vmatpush.msrb.mxu1 %v1255_v10  ;;  %1452 = vmatpush.msra.mxu0 %v1303_v12  ;;  %v958_v10 = vperm.slane %v953_v3, 3 }
 0x1d4   : > { %1412 = vmatpush.msrb.mxu2 %v1271_v16  ;;  %1432 = vmatpush.msrb.mxu3 %v1287_v5  ;;  %v1157_v5 = vld.sshfl [vmem:[#allocation1 + $0x18] sm:$0xff pattern:$0x75316420] }
 0x1d5   : > { %1393 = vmatpush.msrb.mxu1 %v1254_v14  ;;  %1453 = vmatpush.msra.mxu0 %v1302_v15  ;;  %v1154_v14 = vld.sshfl [vmem:[#allocation1] sm:$0xff pattern:$0x75316420] }
 0x1d6   : > { %1413 = vmatpush.msrb.mxu2 %v1270_v9  ;;  %1433 = vmatpush.msrb.mxu3 %v1286_v18  ;;  %v957_v9 = vperm.slane %v953_v3, 2 }
 0x1d7   : > { %1394 = vmatpush.msrb.mxu1 %v1253_v8  ;;  %1454 = vmatpush.msra.mxu0 %v1301_v17  ;;  %v956_v8 = vperm.slane %v953_v3, 1 }
 0x1d8   : > { %1414 = vmatpush.msrb.mxu2 %v1269_v22  ;;  %1434 = vmatpush.msrb.mxu3 %v1285_v24  ;;  %v962_v24 = vperm.slane %v953_v3, 7 }
 0x1d9   : > { %1395 = vmatpush.msrb.mxu1 %v1252_v19  ;;  %1455 = vmatpush.msra.mxu0 %v1300_v20  ;;  %v959_v19 = vperm.slane %v953_v3, 4 }
 0x1da   : > { %1415 = vmatpush.msrb.mxu2 %v1268_v30  ;;  %1435 = vmatpush.msrb.mxu3 %v1284_v31 }
 0x1db   : > { %1396 = vmatpush.msrb.mxu1 %v1251_v25  ;;  %1456 = vmatpush.msra.mxu0 %v1299_v26 }
 0x1dc   : > { %1416 = vmatpush.msrb.mxu2 %v1267_v21  ;;  %1436 = vmatpush.msrb.mxu3 %v1283_v33 }
 0x1dd   : > { %1397 = vmatpush.msrb.mxu1 %v1250_v27  ;;  %1457 = vmatpush.msra.mxu0 %v1298_v6  ;;  %v1155_v27 = vld.sshfl [vmem:[#allocation1 + $0x8] sm:$0xff pattern:$0x75316420] }
 0x1de   : > { %1417 = vmatpush.msrb.mxu2 %v1266_v36  ;;  %1437 = vmatpush.msrb.mxu3 %v1282_v37  ;;  %v960_v36 = vperm.slane %v953_v3, 5 }
 0x1df   : > { %1398 = vmatpush.msrb.mxu1 %v1249_v11  ;;  %1458 = vmatpush.msra.mxu0 %v1297_v32  ;;  %v1156_v11 = vld.sshfl [vmem:[#allocation1 + $0x10] sm:$0xff pattern:$0x75316420] }
 0x1e0   : > { %1418 = vmatpush.msrb.mxu2 %v1265_v41  ;;  %1438 = vmatpush.msrb.mxu3 %v1281_v42 }
 0x1e1   : > { %1399 = vmatpush.msrb.mxu1 %v1248_v23  ;;  %1459 = vmatpush.msra.mxu0 %v1296_v34  ;;  %v1158_v23 = vld.sshfl [vmem:[#allocation1 + $0x20] sm:$0xff pattern:$0x75316420] }
 0x1e2   : > { %1419 = vmatpush.msrb.mxu2 %v1264_v46  ;;  %1439 = vmatpush.msrb.mxu3 %v1280_v47 }
 0x1e3   : > { %1400 = vmatpush.msrb.mxu1 %v1247_v35  ;;  %1460 = vmatpush.msra.mxu0 %v1295_v38  ;;  %v1161_v35 = vld.sshfl [vmem:[#allocation1 + $0x38] sm:$0xff pattern:$0x75316420] }
 0x1e4   : > { %1420 = vmatpush.msrb.mxu2 %v1263_v50  ;;  %1440 = vmatpush.msrb.mxu3 %v1279_v51 }
 0x1e5   : > { %1401 = vmatpush.msrb.mxu1 %v1246_v40  ;;  %1461 = vmatpush.msra.mxu0 %v1294_v43 }
 0x1e6   : > { %1421 = vmatpush.msrb.mxu2 %v1262_v54  ;;  %1441 = vmatpush.msrb.mxu3 %v1278_v55 }
 0x1e7   : > { %1402 = vmatpush.msrb.mxu1 %v1245_v45  ;;  %1462 = vmatpush.msra.mxu0 %v1293_v48  ;;  %v1159_v45 = vld.sshfl [vmem:[#allocation1 + $0x28] sm:$0xff pattern:$0x75316420]  ;;  %v1160_v48 = vld.sshfl [vmem:[#allocation1 + $0x30] sm:$0xff pattern:$0x75316420] }
 0x1e8   : > { %1422 = vmatpush.msrb.mxu2 %v1261_v58  ;;  %1442 = vmatpush.msrb.mxu3 %v1277_v59 }
 0x1e9   : > { %1403 = vmatpush.msrb.mxu1 %v1244_v49  ;;  %1463 = vmatpush.msra.mxu0 %v1292_v52  ;;  %v1601_v52 = vld [vmem:[%s2466_s8] ss:$0 sm:$0xff] }
 0x1ea   : > { %1423 = vmatpush.msrb.mxu2 %v1260_v61  ;;  %1443 = vmatpush.msrb.mxu3 %v1276_v62 }
 0x1eb   : > { %1404 = vmatpush.msrb.mxu1 %v1243_v53  ;;  %1464 = vmatpush.msra.mxu0 %v1291_v56 }
 0x1ec   : > { %1424 = vmatpush.msrb.mxu2 %v1259_v63  ;;  %1444 = vmatpush.msrb.mxu3 %v1275_v0 }
 0x1ed   : > { %1405 = vmatpush.msrb.mxu1 %v1242_v57  ;;  %1465 = vmatpush.msra.mxu0 %v1290_v60 }
 0x1ee   : > { %1425 = vmatpush.msrb.mxu2 %v1258_v1  ;;  %1445 = vmatpush.msrb.mxu3 %v1274_v2 }
 0x228   : > { %v988_v12 = vpop.f32.mrf.mxu1 }
 0x229   : > { %v989_v13 = vadd.f32 %v988_v12, %v955_v4  ;;  %v1048_v7 = vpop.f32.mrf.mxu0 }
 0x22a   : > { %v1049_v15 = vadd.f32 %v1048_v7, %v958_v10 }
 0x22b   : > { %v1131_v16 = vmax.f32 %v989_v13, 0.0 }
 0x22c   : > { %v1134_v17 = vmax.f32 %v1049_v15, 0.0 }
 0x22d   : > { %v1170_v18 = vmul.f32 %v1154_v14, %v1131_v16 }
 0x22e   : > { %v1173_v20 = vmul.f32 %v1157_v5, %v1134_v17  ;;  %v1008_v22 = vpop.f32.mrf.mxu2 }
 0x22f   : > { %v1009_v25 = vadd.f32 %v1008_v22, %v956_v8  ;;  %v1028_v26 = vpop.f32.mrf.mxu3  ;;  %1326 = vmatmul.f32.vlgmr.msra.gmra.mxu1 %v1170_v18 }
 0x230   : > { %v1029_v6 = vadd.f32 %v1028_v26, %v957_v9  ;;  %1386 = vmatmul.f32.vlgmr.msrb.gmra.mxu0 %v1173_v20  ;;  %v1068_v28 = vpop.f32.mrf.mxu1 }
 0x231   : > { %v1132_v29 = vmax.f32 %v1009_v25, 0.0  ;;  %v1069_v30 = vadd.f32 %v1068_v28, %v959_v19  ;;  %v1128_v31 = vpop.f32.mrf.mxu0 }
 0x232   : > { %v1133_v32 = vmax.f32 %v1029_v6, 0.0  ;;  %v1129_v21 = vadd.f32 %v1128_v31, %v962_v24 }
 0x233   : > { %v1171_v33 = vmul.f32 %v1155_v27, %v1132_v29  ;;  %v1135_v34 = vmax.f32 %v1069_v30, 0.0 }
 0x234   : > { %v1172_v37 = vmul.f32 %v1156_v11, %v1133_v32  ;;  %v1138_v38 = vmax.f32 %v1129_v21, 0.0 }
 0x235   : > { %v1174_v40 = vmul.f32 %v1158_v23, %v1135_v34  ;;  %1346 = vmatmul.f32.vlgmr.msra.gmra.mxu2 %v1171_v33 }
 0x236   : > { %v1177_v41 = vmul.f32 %v1161_v35, %v1138_v38  ;;  %1366 = vmatmul.f32.vlgmr.msra.gmra.mxu3 %v1172_v37  ;;  %v1088_v42 = vpop.f32.mrf.mxu2 }
 0x237   : > { %v1089_v43 = vadd.f32 %v1088_v42, %v960_v36  ;;  %v1108_v44 = vpop.f32.mrf.mxu3  ;;  %1406 = vmatmul.f32.vlgmr.msrb.gmra.mxu1 %v1174_v40 }
 0x238   : > { %v1109_v46 = vadd.f32 %v1108_v44, %v961_v39  ;;  %1466 = vmatmul.f32.vlgmr.msra.gmra.mxu0 %v1177_v41 }
 0x239   : > { %v1136_v47 = vmax.f32 %v1089_v43, 0.0 }
 0x23a   : > { %v1137_v49 = vmax.f32 %v1109_v46, 0.0 }
 0x23b   : > { %v1175_v50 = vmul.f32 %v1159_v45, %v1136_v47 }
 0x23c   : > { %v1176_v51 = vmul.f32 %v1160_v48, %v1137_v49 }
 0x23d   : > { %1426 = vmatmul.f32.vlgmr.msrb.gmra.mxu2 %v1175_v50 }
 0x23e   : > { %1446 = vmatmul.f32.vlgmr.msrb.gmra.mxu3 %v1176_v51 }
 0x2ac   : > { %v1327_v53 = vpop.f32.mrf.mxu1 }
 0x2ad   : > { %v1328_v54 = vadd.f32 %v1601_v52, %v1327_v53  ;;  %v1387_v58 = vpop.f32.mrf.mxu0 }
 0x2b4   : > { %v1407_v61 = vpop.f32.mrf.mxu1 }
 0x2b5   : > { %v1467_v3 = vpop.f32.mrf.mxu0 }
 0x2b8   : > { %v1347_v55 = vpop.f32.mrf.mxu2 }
 0x2b9   : > { %v1348_v56 = vadd.f32 %v1347_v55, %v1328_v54  ;;  %v1367_v57 = vpop.f32.mrf.mxu3 }
 0x2bb   : > { %v1368_v59 = vadd.f32 %v1367_v57, %v1348_v56 }
 0x2bd   : > { %v1388_v60 = vadd.f32 %v1387_v58, %v1368_v59 }
 0x2bf   : > { %v1408_v62 = vadd.f32 %v1407_v61, %v1388_v60 }
 0x2c0   : > { %v1427_v63 = vpop.f32.mrf.mxu2 }
 0x2c1   : > { %v1428_v0 = vadd.f32 %v1427_v63, %v1408_v62  ;;  %v1447_v1 = vpop.f32.mrf.mxu3 }
 0x2c3   : > { %v1448_v2 = vadd.f32 %v1447_v1, %v1428_v0 }
 0x2c5   : > { %v1468_v4 = vadd.f32 %v1467_v3, %v1448_v2 }
 0x2c7   : > { %1470 = vst [vmem:[#allocation7] sm:$0xf] %v1468_v4 }
 0x2c8 PF: > { %p1567_p13 = scmp.eq.s32.totalorder %s1773_s20, 1  ;;  %s1696_s22 = smov [#allocation7]  }
 0x2c9   : > { %s1477_s23 = sshll.u32 %s1696_s22, 4  ;;  %s1479_s19 = sshll.u32 %s2469_s11, 4  ;;  %s1478_s23 = int_to_ptr.vmem [resolvable:$true] %s1477_s23  ;;  %s1480_s19 = int_to_ptr.hbm [resolvable:$true] %s1479_s19 }
 0x2ca   : > { %1558 = dma.vmem_to_hbm [thread:$0]  (%p1567_p13), %s1478_s23, 64, %s1480_s19, [#allocation6]  }
 0x2cb   : > { %1677 = dma.done.wait (%p1567_p13), [#allocation6], 64  }
 0x2cc   : > { %1679 = vsyncadd (%p1567_p13), [#allocation6], 4294967232 }
 0x2cd PF: > { %p20_p0 = scmp.ge.s32.totalorder %s1776_s21, 4   ;;  %s2472_s17 = smov %s1686_s18 }
 0x2ce   : > { %s2473_s18 = smov %s1786_s24  ;;  %s2474_s19 = smov %s1776_s21 }
 0x2cf   :  { %22 = sbr.rel (!%p20_p0) target bundleno = 3 (0x3), region = 150 }
 0x2d4   :  { %1493 = vsyncpa [#allocation5], 1 }
 0x2d5   :  { %1495 = vsyncpa [#allocation5 + $0x1], 1 }
 0x2d6   :  { %1496 = vsyncpa [#allocation6], 1 }
 0x2d7   :  { %1498 = vsyncpa [#allocation6 + $0x1], 1 }

</bundles_post_ra>
